<compile_context>
chip_gen: v7x
topology: tpu7x:2x2x1
jax: 0.10.0
libtpu: 0.0.40
codegen_flags: <defaults>
</compile_context>

<pallas_src>
import jax
import jax.numpy as jnp
import numpy as np
from jax.experimental import pallas as pl
from jax.experimental.pallas import tpu as pltpu


def _round_up(x, m):
    return ((x + m - 1) // m) * m


def _make_kernel(num_layers, k, c2, dim_pos, mlp_dims, tile):
    """Kernel over one (batch, N1-tile) block.

    refs = [packed, w_pos, bias_all, w_1..w_L, out]
      packed block: (1, 1, k*TILE, C2+4) bf16, channels = [feat | norm,a0,a1,a2],
                    rows ordered neighbor-major (k slabs of TILE points each).
      w_pos:        (4, dim_pos) f32, posembed weight with BN scale folded in.
      bias_all:     (1, dim_pos + sum(mlp)) f32, [b_pos | b_1 | ... | b_L].
      w_i:          (C_in_i, C_out_i) bf16, BN scale folded in.
      out block:    (1, mlp[-1], TILE) f32.
    """
    offs = [0, dim_pos]
    for c in mlp_dims:
        offs.append(offs[-1] + c)

    def kernel(packed_ref, wpos_ref, bias_ref, *rest):
        w_refs = rest[:num_layers]
        o_ref = rest[num_layers]

        rows = packed_ref[0, 0]                          # (k*TILE, C2+4) bf16
        feat = rows[:, 0:c2]                             # bf16, straight to MXU
        rel = rows[:, c2:c2 + 4].astype(jnp.float32)     # [norm, a0, a1, a2]
        wpos = wpos_ref[...]                             # (4, dim_pos) f32
        bias = bias_ref[...]                             # (1, dim_pos+sum(mlp))

        # posembed = LeakyReLU(BN(Conv1x1([norm, angle]))) as 4 broadcast FMAs
        # on the VPU (no tiny-K MXU matmul); BN scale already folded into wpos.
        pos = (rel[:, 0:1] * wpos[0:1, :] + rel[:, 1:2] * wpos[1:2, :]
               + rel[:, 2:3] * wpos[2:3, :] + rel[:, 3:4] * wpos[3:4, :])
        pos = pos + bias[:, 0:dim_pos]
        pos = jnp.where(pos > 0, pos, 0.2 * pos)

        # Merged first-layer operand: cat(feat, pos) -> one K = C2+dim_pos dot
        # per layer, with the k neighbors batched along M = k*TILE.
        x = jnp.concatenate([feat, pos.astype(jnp.bfloat16)], axis=-1)
        for i in range(num_layers):
            h = jnp.dot(x, w_refs[i][...], preferred_element_type=jnp.float32)
            h = jnp.maximum(h + bias[:, offs[i + 1]:offs[i + 2]], 0.0)
            x = h.astype(jnp.bfloat16) if i + 1 < num_layers else h

        # Sum over the k neighbor slabs (static sublane slices), then transpose
        # so the store is lane-dense in PyTorch's (C, N1) layout.
        acc = x[0:tile]
        for j in range(1, k):
            acc = acc + x[j * tile:(j + 1) * tile]
        o_ref[0] = acc.T

    return kernel


def _knn_and_gather(xyz1, xyz2, feat2, lrf2, k):
    """Plain-JAX glue: k nearest neighbors (top_k) + gathers."""
    # TODO(synk): kNN + index gathers have no clean Pallas equivalent on TPU;
    # they stay in XLA (top_k instead of a full argsort).
    B, N1, _ = xyz1.shape
    _, N2, _ = feat2.shape
    d2 = (jnp.sum(xyz1 ** 2, -1)[:, :, None]
          + jnp.sum(xyz2 ** 2, -1)[:, None, :]
          - 2.0 * jnp.einsum('bmc,bnc->bmn', xyz1, xyz2))
    _, inds = jax.lax.top_k(-d2, k)                               # (B, N1, k)
    bidx = jnp.arange(B)[:, None, None]
    interp_feat = feat2[bidx, inds]                               # (B, N1, k, C2)
    close_xyz = xyz2[bidx, inds]                                  # (B, N1, k, 3)
    lrf_g = lrf2.reshape(B, N2, 9)[bidx, inds]                    # (B, N1, k, 9)
    xyz1_rep = jnp.broadcast_to(xyz1[:, :, None, :], (B, N1, k, 3))
    return xyz1_rep, close_xyz, lrf_g, interp_feat


def _relative_pos(xyz1_rep, close_xyz, lrf_g):
    """[norm | angle] per (point, neighbor), computed in f32 in XLA."""
    B, N1, k, _ = xyz1_rep.shape
    diff = xyz1_rep - close_xyz                                   # relate_position
    norm = jnp.sqrt(jnp.sum(diff * diff, -1, keepdims=True))
    unit = diff / jnp.maximum(norm, 1e-12)                        # F.normalize eps
    lrf_m = lrf_g.reshape(B, N1, k, 3, 3)
    angle = jnp.einsum('bnkij,bnkj->bnki', lrf_m, unit)
    return jnp.concatenate([norm, angle], -1)                     # (B, N1, k, 4)


def fp_module_angle_forward(xyz1, xyz2, feat2, lrf2, params, k=3, tile_n1=1024):
    assert tile_n1 % 128 == 0
    B, N1, _ = xyz1.shape
    _, N2, C2 = feat2.shape
    layers = params['layers']
    num_layers = len(layers)
    dim_pos = params['w_pos'].shape[1]
    mlp_dims = [w.shape[1] for (w, _, _) in layers]
    c_out = mlp_dims[-1]
    cp = C2 + 4

    # kNN + gathers + geometry in XLA; pack [feat | norm, angle] in bf16.
    xyz1_rep, close_xyz, lrf_g, interp_feat = _knn_and_gather(
        xyz1, xyz2, feat2, lrf2, k)
    relpos = _relative_pos(xyz1_rep, close_xyz, lrf_g)
    packed = jnp.concatenate([interp_feat, relpos],
                             axis=-1).astype(jnp.bfloat16)        # (B, N1, k, cp)

    # Tile selection: multiple of 128; keep >= 2 grid blocks for v7x megacore.
    if N1 <= tile_n1:
        tile = _round_up(N1, 128)
    else:
        tile = tile_n1
    if B == 1 and N1 > 128 and _round_up(N1, tile) // tile < 2:
        tile = _round_up((N1 + 1) // 2, 128)
    n1p = _round_up(N1, tile)
    n_tiles = n1p // tile
    if n1p != N1:
        packed = jnp.pad(packed, ((0, 0), (0, n1p - N1), (0, 0), (0, 0)))

    # Neighbor-major layout within each tile: (B, n_tiles, k*TILE, cp) so the
    # kernel batches the k neighbors along the matmul M dimension and k-sums
    # with static sublane slices.  One contiguous DMA block per grid step.
    packed = packed.reshape(B, n_tiles, tile, k, cp)
    packed = jnp.transpose(packed, (0, 1, 3, 2, 4))
    packed = packed.reshape(B, n_tiles, k * tile, cp)

    # Fold BN scales into weights in f32, then cast matmul weights to bf16.
    # All biases go into one small lane-packed array.
    w_pos = (params['w_pos'] * params['s_pos']).astype(jnp.float32)
    biases = [params['b_pos'].astype(jnp.float32)]
    w_list = []
    for (w, s, b) in layers:
        w_list.append((w * s).astype(jnp.bfloat16))
        biases.append(b.astype(jnp.float32))
    bias_all = jnp.concatenate(biases, axis=-1)       # (1, dim_pos + sum(mlp))

    in_arrays = [packed, w_pos, bias_all] + w_list

    def full_spec(a):
        nd = a.ndim
        return pl.BlockSpec(a.shape, lambda b, t: (0,) * nd)

    in_specs = ([pl.BlockSpec((1, 1, k * tile, cp), lambda b, t: (b, t, 0, 0))]
                + [full_spec(a) for a in in_arrays[1:]])

    out = pl.pallas_call(
        _make_kernel(num_layers, k, C2, dim_pos, mlp_dims, tile),
        out_shape=jax.ShapeDtypeStruct((B, c_out, n1p), jnp.float32),
        grid=(B, n_tiles),
        in_specs=in_specs,
        out_specs=pl.BlockSpec((1, c_out, tile), lambda b, t: (b, 0, t)),
        compiler_params=pltpu.CompilerParams(
            dimension_semantics=("parallel", "parallel"),
            vmem_limit_bytes=32 * 1024 * 1024),
    )(*in_arrays)

    # Already in PyTorch's (B, mlp[-1], N1) layout; just drop the N1 padding.
    return out[:, :, :N1]


def reference_forward(xyz1, xyz2, feat2, lrf2, params, k=3):
    """Pure-JAX f32 reference mirroring the PyTorch forward (eval-mode BN)."""
    xyz1_rep, close_xyz, lrf_g, interp_feat = _knn_and_gather(
        xyz1, xyz2, feat2, lrf2, k)
    rel = _relative_pos(xyz1_rep, close_xyz, lrf_g)               # (B,N1,k,4)
    pos = rel @ params['w_pos']
    pos = pos * params['s_pos'][0] + params['b_pos'][0]
    pos = jnp.where(pos > 0, pos, 0.2 * pos)
    x = jnp.concatenate([interp_feat, pos], -1)
    for (w, s, b) in params['layers']:
        x = x @ w
        x = x * s[0] + b[0]
        x = jnp.maximum(x, 0.0)
    x = jnp.sum(x, axis=2)                                        # sum over k
    return jnp.transpose(x, (0, 2, 1))                            # (B, C, N1)


def init_params(key, in_channels, mlp, dim_posembed=32, eps=1e-5):
    """Deterministic synthetic weights; BN folded into per-channel scale/bias."""
    def fold_bn(kg, c):
        k1, k2, k3, k4 = jax.random.split(kg, 4)
        gamma = jax.random.uniform(k1, (1, c), jnp.float32, 0.5, 1.5)
        beta = jax.random.uniform(k2, (1, c), jnp.float32, -0.1, 0.1)
        mean = jax.random.uniform(k3, (1, c), jnp.float32, -0.1, 0.1)
        var = jax.random.uniform(k4, (1, c), jnp.float32, 0.5, 1.5)
        scale = gamma / jnp.sqrt(var + eps)
        bias = beta - mean * scale
        return scale, bias

    keys = jax.random.split(key, 2 + 2 * len(mlp))
    # Conv2d(4, dim_posembed, 1, bias=False): weight stored as (Cin, Cout)
    w_pos = jax.random.normal(keys[0], (4, dim_posembed), jnp.float32) * 0.1
    s_pos, b_pos = fold_bn(keys[1], dim_posembed)
    layers = []
    cin = in_channels + dim_posembed
    for i, cout in enumerate(mlp):
        w = (jax.random.normal(keys[2 + 2 * i], (cin, cout), jnp.float32)
             * (1.0 / np.sqrt(cin)))
        s, b = fold_bn(keys[3 + 2 * i], cout)
        layers.append((w, s, b))
        cin = cout
    return {'w_pos': w_pos, 's_pos': s_pos, 'b_pos': b_pos, 'layers': layers}


if __name__ == "__main__":
    B, N1, N2, C2, K = 2, 16, 8, 16, 3
    mlp = (32, 64)

    key = jax.random.PRNGKey(0)
    k1, k2, k3, k4 = jax.random.split(key, 4)
    xyz1 = jax.random.normal(k1, (B, N1, 3), jnp.float32)
    xyz2 = jax.random.normal(k2, (B, N2, 3), jnp.float32)
    feat2 = jax.random.normal(k3, (B, N2, C2), jnp.float32)
    lrf2 = jax.random.normal(k4, (B, N2, 3, 3), jnp.float32)

    params = init_params(jax.random.PRNGKey(42), C2, mlp)

    out = fp_module_angle_forward(xyz1, xyz2, feat2, lrf2, params, k=K)
    out = jax.block_until_ready(out)
    assert out.shape == (B, mlp[-1], N1)

    ref = reference_forward(xyz1, xyz2, feat2, lrf2, params, k=K)
    # bf16 MXU matmuls + bf16-packed geometry vs a pure-f32 reference.
    np.testing.assert_allclose(np.asarray(out), np.asarray(ref),
                               rtol=3e-2, atol=3e-2)
    print("KERNEL_OK")
</pallas_src>

<mosaic_0001>
module attributes {stable_mosaic.version = 11 : i64} {
  func.func @kernel(%arg0: i32, %arg1: i32, %arg2: memref<1x1x384x20xbf16, #tpu.memory_space<vmem>>, %arg3: memref<4x32xf32, #tpu.memory_space<vmem>>, %arg4: memref<1x128xf32, #tpu.memory_space<vmem>>, %arg5: memref<48x32xbf16, #tpu.memory_space<vmem>>, %arg6: memref<32x64xbf16, #tpu.memory_space<vmem>>, %arg7: memref<1x64x128xf32, #tpu.memory_space<vmem>>) attributes {dimension_semantics = [#tpu.dimension_semantics<parallel>, #tpu.dimension_semantics<parallel>], iteration_bounds = array<i64: 2, 1>, scalar_prefetch = 0 : i64, scratch_operands = 0 : i64, tpu.core_type = #tpu.core_type<tc>, window_params = [{transform_indices = @transform_0, window_bounds = array<i64: 1, 1, 384, 20>}, {pipeline_mode = #tpu.pipeline_mode<synchronous>, transform_indices = @transform_1, window_bounds = array<i64: 4, 32>}, {pipeline_mode = #tpu.pipeline_mode<synchronous>, transform_indices = @transform_2, window_bounds = array<i64: 1, 128>}, {pipeline_mode = #tpu.pipeline_mode<synchronous>, transform_indices = @transform_3, window_bounds = array<i64: 48, 32>}, {pipeline_mode = #tpu.pipeline_mode<synchronous>, transform_indices = @transform_4, window_bounds = array<i64: 32, 64>}, {transform_indices = @transform_5, window_bounds = array<i64: 1, 64, 128>}]} {
    %c0 = arith.constant 0 : index
    %c0_0 = arith.constant 0 : index
    %c0_1 = arith.constant 0 : index
    %c0_2 = arith.constant 0 : index
    %0 = vector.load %arg2[%c0, %c0_0, %c0_1, %c0_2] : memref<1x1x384x20xbf16, #tpu.memory_space<vmem>>, vector<1x1x384x20xbf16>
    %1 = vector.shape_cast %0 : vector<1x1x384x20xbf16> to vector<384x20xbf16>
    %2 = vector.extract_strided_slice %1 {offsets = [0, 0], sizes = [384, 16], strides = [1, 1]} : vector<384x20xbf16> to vector<384x16xbf16>
    %3 = vector.extract_strided_slice %1 {offsets = [0, 16], sizes = [384, 4], strides = [1, 1]} : vector<384x20xbf16> to vector<384x4xbf16>
    %4 = arith.extf %3 : vector<384x4xbf16> to vector<384x4xf32>
    %c0_3 = arith.constant 0 : index
    %c0_4 = arith.constant 0 : index
    %5 = vector.load %arg3[%c0_3, %c0_4] : memref<4x32xf32, #tpu.memory_space<vmem>>, vector<4x32xf32>
    %c0_5 = arith.constant 0 : index
    %c0_6 = arith.constant 0 : index
    %6 = vector.load %arg4[%c0_5, %c0_6] : memref<1x128xf32, #tpu.memory_space<vmem>>, vector<1x128xf32>
    %7 = vector.extract_strided_slice %4 {offsets = [0, 0], sizes = [384, 1], strides = [1, 1]} : vector<384x4xf32> to vector<384x1xf32>
    %8 = vector.extract_strided_slice %5 {offsets = [0, 0], sizes = [1, 32], strides = [1, 1]} : vector<4x32xf32> to vector<1x32xf32>
    %9 = vector.broadcast %7 : vector<384x1xf32> to vector<384x32xf32>
    %10 = vector.broadcast %8 : vector<1x32xf32> to vector<384x32xf32>
    %11 = arith.mulf %9, %10 : vector<384x32xf32>
    %12 = vector.extract_strided_slice %4 {offsets = [0, 1], sizes = [384, 1], strides = [1, 1]} : vector<384x4xf32> to vector<384x1xf32>
    %13 = vector.extract_strided_slice %5 {offsets = [1, 0], sizes = [1, 32], strides = [1, 1]} : vector<4x32xf32> to vector<1x32xf32>
    %14 = vector.broadcast %12 : vector<384x1xf32> to vector<384x32xf32>
    %15 = vector.broadcast %13 : vector<1x32xf32> to vector<384x32xf32>
    %16 = arith.mulf %14, %15 : vector<384x32xf32>
    %17 = arith.addf %11, %16 : vector<384x32xf32>
    %18 = vector.extract_strided_slice %4 {offsets = [0, 2], sizes = [384, 1], strides = [1, 1]} : vector<384x4xf32> to vector<384x1xf32>
    %19 = vector.extract_strided_slice %5 {offsets = [2, 0], sizes = [1, 32], strides = [1, 1]} : vector<4x32xf32> to vector<1x32xf32>
    %20 = vector.broadcast %18 : vector<384x1xf32> to vector<384x32xf32>
    %21 = vector.broadcast %19 : vector<1x32xf32> to vector<384x32xf32>
    %22 = arith.mulf %20, %21 : vector<384x32xf32>
    %23 = arith.addf %17, %22 : vector<384x32xf32>
    %24 = vector.extract_strided_slice %4 {offsets = [0, 3], sizes = [384, 1], strides = [1, 1]} : vector<384x4xf32> to vector<384x1xf32>
    %25 = vector.extract_strided_slice %5 {offsets = [3, 0], sizes = [1, 32], strides = [1, 1]} : vector<4x32xf32> to vector<1x32xf32>
    %26 = vector.broadcast %24 : vector<384x1xf32> to vector<384x32xf32>
    %27 = vector.broadcast %25 : vector<1x32xf32> to vector<384x32xf32>
    %28 = arith.mulf %26, %27 : vector<384x32xf32>
    %29 = arith.addf %23, %28 : vector<384x32xf32>
    %30 = vector.extract_strided_slice %6 {offsets = [0, 0], sizes = [1, 32], strides = [1, 1]} : vector<1x128xf32> to vector<1x32xf32>
    %31 = vector.broadcast %30 : vector<1x32xf32> to vector<384x32xf32>
    %32 = arith.addf %29, %31 : vector<384x32xf32>
    %cst = arith.constant 0.000000e+00 : f32
    %33 = vector.broadcast %cst : f32 to vector<384x32xf32>
    %34 = arith.cmpf ogt, %32, %33 : vector<384x32xf32>
    %cst_7 = arith.constant 2.000000e-01 : f32
    %35 = vector.broadcast %cst_7 : f32 to vector<384x32xf32>
    %36 = arith.mulf %35, %32 : vector<384x32xf32>
    %37 = arith.select %34, %32, %36 : vector<384x32xi1>, vector<384x32xf32>
    %38 = arith.truncf %37 : vector<384x32xf32> to vector<384x32xbf16>
    %39 = tpu.concatenate %2, %38 in 1 : vector<384x16xbf16>, vector<384x32xbf16> -> vector<384x48xbf16>
    %c0_8 = arith.constant 0 : index
    %c0_9 = arith.constant 0 : index
    %40 = vector.load %arg5[%c0_8, %c0_9] : memref<48x32xbf16, #tpu.memory_space<vmem>>, vector<48x32xbf16>
    %cst_10 = arith.constant dense<0.000000e+00> : vector<384x32xf32>
    %41 = tpu.matmul %39, %40, %cst_10 {dimension_numbers = #tpu.dot_dimension_numbers<[1], [0], [0], [1], [0, 0, 1, 1], [], []>} : vector<384x48xbf16>, vector<48x32xbf16>, vector<384x32xf32> -> vector<384x32xf32>
    %42 = vector.extract_strided_slice %6 {offsets = [0, 32], sizes = [1, 32], strides = [1, 1]} : vector<1x128xf32> to vector<1x32xf32>
    %43 = vector.broadcast %42 : vector<1x32xf32> to vector<384x32xf32>
    %44 = arith.addf %41, %43 : vector<384x32xf32>
    %cst_11 = arith.constant 0.000000e+00 : f32
    %45 = vector.broadcast %cst_11 : f32 to vector<384x32xf32>
    %46 = arith.maximumf %44, %45 : vector<384x32xf32>
    %47 = arith.truncf %46 : vector<384x32xf32> to vector<384x32xbf16>
    %c0_12 = arith.constant 0 : index
    %c0_13 = arith.constant 0 : index
    %48 = vector.load %arg6[%c0_12, %c0_13] : memref<32x64xbf16, #tpu.memory_space<vmem>>, vector<32x64xbf16>
    %cst_14 = arith.constant dense<0.000000e+00> : vector<384x64xf32>
    %49 = tpu.matmul %47, %48, %cst_14 {dimension_numbers = #tpu.dot_dimension_numbers<[1], [0], [0], [1], [0, 0, 1, 1], [], []>} : vector<384x32xbf16>, vector<32x64xbf16>, vector<384x64xf32> -> vector<384x64xf32>
    %50 = vector.extract_strided_slice %6 {offsets = [0, 64], sizes = [1, 64], strides = [1, 1]} : vector<1x128xf32> to vector<1x64xf32>
    %51 = vector.broadcast %50 : vector<1x64xf32> to vector<384x64xf32>
    %52 = arith.addf %49, %51 : vector<384x64xf32>
    %cst_15 = arith.constant 0.000000e+00 : f32
    %53 = vector.broadcast %cst_15 : f32 to vector<384x64xf32>
    %54 = arith.maximumf %52, %53 : vector<384x64xf32>
    %55 = vector.extract_strided_slice %54 {offsets = [0, 0], sizes = [128, 64], strides = [1, 1]} : vector<384x64xf32> to vector<128x64xf32>
    %56 = vector.extract_strided_slice %54 {offsets = [128, 0], sizes = [128, 64], strides = [1, 1]} : vector<384x64xf32> to vector<128x64xf32>
    %57 = arith.addf %55, %56 : vector<128x64xf32>
    %58 = vector.extract_strided_slice %54 {offsets = [256, 0], sizes = [128, 64], strides = [1, 1]} : vector<384x64xf32> to vector<128x64xf32>
    %59 = arith.addf %57, %58 : vector<128x64xf32>
    %60 = tpu.transpose %59, [1, 0] : vector<128x64xf32> -> vector<64x128xf32>
    %c0_16 = arith.constant 0 : index
    %c0_17 = arith.constant 0 : index
    %c0_18 = arith.constant 0 : index
    %61 = vector.load %arg7[%c0_16, %c0_17, %c0_18] : memref<1x64x128xf32, #tpu.memory_space<vmem>>, vector<1x64x128xf32>
    %62 = vector.shape_cast %61 : vector<1x64x128xf32> to vector<64x128xf32>
    %63 = vector.shape_cast %60 : vector<64x128xf32> to vector<1x64x128xf32>
    tpu.vector_store %arg7[%c0_16, %c0_17, %c0_18], %63 {strides = array<i32>} : memref<1x64x128xf32, #tpu.memory_space<vmem>>, vector<1x64x128xf32>,
    return
  }
  func.func @transform_0(%arg0: i32, %arg1: i32) -> (i32, i32, i32, i32) {
    %c0_i32 = arith.constant 0 : i32
    %c0_i32_0 = arith.constant 0 : i32
    %c0_i32_1 = arith.constant 0 : i32
    return %arg0, %arg1, %c0_i32, %c0_i32_0 : i32, i32, i32, i32
  }
  func.func @transform_1(%arg0: i32, %arg1: i32) -> (i32, i32) {
    %c0_i32 = arith.constant 0 : i32
    %c0_i32_0 = arith.constant 0 : i32
    %c0_i32_1 = arith.constant 0 : i32
    return %c0_i32, %c0_i32_0 : i32, i32
  }
  func.func @transform_2(%arg0: i32, %arg1: i32) -> (i32, i32) {
    %c0_i32 = arith.constant 0 : i32
    %c0_i32_0 = arith.constant 0 : i32
    %c0_i32_1 = arith.constant 0 : i32
    return %c0_i32, %c0_i32_0 : i32, i32
  }
  func.func @transform_3(%arg0: i32, %arg1: i32) -> (i32, i32) {
    %c0_i32 = arith.constant 0 : i32
    %c0_i32_0 = arith.constant 0 : i32
    %c0_i32_1 = arith.constant 0 : i32
    return %c0_i32, %c0_i32_0 : i32, i32
  }
  func.func @transform_4(%arg0: i32, %arg1: i32) -> (i32, i32) {
    %c0_i32 = arith.constant 0 : i32
    %c0_i32_0 = arith.constant 0 : i32
    %c0_i32_1 = arith.constant 0 : i32
    return %c0_i32, %c0_i32_0 : i32, i32
  }
  func.func @transform_5(%arg0: i32, %arg1: i32) -> (i32, i32, i32) {
    %c0_i32 = arith.constant 0 : i32
    %c0_i32_0 = arith.constant 0 : i32
    return %arg0, %c0_i32, %arg1 : i32, i32, i32
  }
}

</mosaic_0001>

<bundles_post_ra>
// kernel: tpu_custom_call.1
= control target key start
LH: loop header
LB: loop body
LE: loop exit
PB: predicated region body
PF: predicated region fallthrough
CT: control target
= control target key end

     0   :  { %10 = vsyncpa [#allocation3], 0  ;;  %s5120_s0 = inlined_call_operand.vmem [shape: bf16[2,1,384,20], index: 0, kind: input, shape index: {}]   ;;  %s5121_s1 = inlined_call_operand.vmem [shape: f32[4,32], index: 1, kind: input, shape index: {}]   ;;  %s5122_s2 = inlined_call_operand.vmem [shape: f32[1,128], index: 2, kind: input, shape index: {}]   ;;  %s5123_s3 = inlined_call_operand.vmem [shape: bf16[48,32], index: 3, kind: input, shape index: {}]   ;;  %s5124_s4 = inlined_call_operand.vmem [shape: bf16[32,64], index: 4, kind: input, shape index: {}]   ;;  %s5125_s5 = inlined_call_operand.hbm [shape: f32[2,64,128], index: 5, kind: output, shape index: {}]  }
   0x1   :  { %12 = vsyncpa [#allocation3 + $0x1], 0  ;;  %s3951_s18 = smov 0   ;;  %s3953_s19 = smov 0  }
   0x2   :  { %s3955_s20 = smov 0   ;;  %s3957_s21 = smov 0  }
   0x3   :  { %s3959_s22 = smov 0   ;;  %s3961_s23 = smov 0  }
   0x4 LB: > { %s2911_s24 = sadd.s32 4294967295, %s3909_s23   ;;  %s2912_s25 = sadd.s32 4294967294, %s3909_s23   ;;  %s3909_s23 = sphi %s3961_s23, %s18_s23   ;;  %s3905_s22 = sphi %s3959_s22, %s5168_s22   ;;  %s3901_s21 = sphi %s3957_s21, %s5167_s21   ;;  %s3897_s20 = sphi %s3955_s20, %s5166_s20   ;;  %s3893_s19 = sphi %s3953_s19, %s5165_s19   ;;  %s3889_s18 = sphi %s3951_s18, %s5164_s18  }
   0x5   : > { %s30_s26 = sadd.s32 1, %s3905_s22  ;;  %s151_s27 = sadd.s32 1, %s3897_s20 }
   0x6   : > { %p32_p0 = scmp.ge.s32.totalorder %s30_s26, 2  ;;  %p161_p1 = scmp.ne.s32.totalorder %s3897_s20, %s3893_s19 }
   0x7   : > { %p162_p2 = scmp.eq.s32.totalorder %s2911_s24, 1  ;;  %p167_p3 = scmp.ne.s32.totalorder %s3893_s19, %s3889_s18 }
   0x8   : > { %s5170_s26 = smov (%p32_p0, %s30_s26), 0  ;;  %p168_p5 = scmp.eq.s32.totalorder %s2912_s25, 1 }
   0x9   : > { %p3991_p4 = por %p162_p2, %p161_p1  ;;  %s146_s29 = ssub.s32 %s3905_s22, %s5170_s26 }
   0xa   : > { %p2915_p6 = scmp.ge.s32.totalorder %s3909_s23, 1  ;;  %p149_p7 = scmp.eq.s32.totalorder %s146_s29, 0 }
   0xb   : > { %p3998_p8 = por %p168_p5, %p167_p3  ;;  %p210_p9 = scmp.lt.s32.totalorder %s3909_s23, 3 }
   0xc   : > { %s4004_s6 = scalar_select %p149_p7, %s3897_s20, %s151_s27  }
   0xd   : > { %p211_p10 = pnand %p2915_p6, %p210_p9 }
   0xf   : > { %214 = sbr.rel (%p211_p10) target bundleno = 1141 (0x475), region = 40 }
  0x16   : > { %p242_p11 = scmp.lt.s32.totalorder %s3901_s21, 1  ;;  %v5137_v0 = vmov 17   ;;  %v5130_v1 = vmov 16   ;;  %s3915_s16 = smov 16  }
  0x17   : > { %3272 = vset.pattern.permute.xlu0 %v5137_v0  ;;  %3226 = vset.pattern.permute.xlu1 %v5130_v1  ;;  %s3916_s10 = smov 96   ;;  %s3001_s27 = sshll.u32 %s3901_s21, 10 }
  0x18   : > { %s243_s7 = scalar_select %p242_p11, %s3901_s21, 1 }
  0x19   : > { %s3918_s21 = smov [#allocation2]  }
  0x1a   : > { %s3161_s8 = smul.u32 192, %s243_s7  ;;  %s3835_s12 = sshll.u32 %s3918_s21, 4  ;;  %s3836_s12 = int_to_ptr.vmem [resolvable:$false] %s3835_s12 }
  0x1b   : > { %s3837_s13 = scalar_lea.vmem %s3836_s12, 2048 }
  0x1c   : > { %s4013_s11 = scalar_lea.vmem %s5120_s0, %s3161_s8  ;;  %s5072_s8 = scalar_lea.hbm %s5125_s5, %s3001_s27 }
  0x1d   : > { %v256_v2 = vld [vmem:[%s4013_s11 + $0x10] sm:$0xff]   ;;  %v252_v3 = vld [vmem:[%s4013_s11] sm:$0xff]   ;;  %v258_v4 = vld [vmem:[%s4013_s11 + $0x18] sm:$0xff]  }
  0x1e   : > { %v304_v5 = vunpack.c.l.bf16 %v256_v2  ;;  %v305_v6 = vunpack.c.h.bf16 %v256_v2  ;;  %v300_v7 = vunpack.c.l.bf16 %v252_v3  ;;  %v301_v8 = vunpack.c.h.bf16 %v252_v3  ;;  %v262_v9 = vld [vmem:[%s4013_s11 + $0x28] sm:$0xff]   ;;  %v260_v12 = vld [vmem:[%s4013_s11 + $0x20] sm:$0xff]   ;;  %v266_v20 = vld [vmem:[%s4013_s11 + $0x38] sm:$0xff]  }
  0x1f   : > { %v306_v10 = vunpack.c.l.bf16 %v258_v4  ;;  %v307_v11 = vunpack.c.h.bf16 %v258_v4  ;;  %v310_v15 = vunpack.c.l.bf16 %v262_v9  ;;  %v311_v16 = vunpack.c.h.bf16 %v262_v9  ;;  %v264_v21 = vld [vmem:[%s4013_s11 + $0x30] sm:$0xff]   ;;  %v270_v28 = vld [vmem:[%s4013_s11 + $0x48] sm:$0xff]   ;;  %v268_v29 = vld [vmem:[%s4013_s11 + $0x40] sm:$0xff]  }
  0x20   : > { %v4020_v13 = vpack.i.bf16 %v305_v6, %v304_v5  ;;  %v4022_v14 = vpack.i.bf16 %v301_v8, %v300_v7  ;;  %v308_v18 = vunpack.c.l.bf16 %v260_v12  ;;  %v309_v19 = vunpack.c.h.bf16 %v260_v12  ;;  %v274_v30 = vld [vmem:[%s4013_s11 + $0x58] sm:$0xff]   ;;  %v272_v31 = vld [vmem:[%s4013_s11 + $0x50] sm:$0xff]   ;;  %v278_v42 = vld [vmem:[%s4013_s11 + $0x68] sm:$0xff]  }
  0x21   : > { %v4026_v17 = vpack.i.bf16 %v307_v11, %v306_v10  ;;  %v4030_v22 = vpack.i.bf16 %v311_v16, %v310_v15  ;;  %v314_v23 = vunpack.c.l.bf16 %v266_v20  ;;  %v315_v25 = vunpack.c.h.bf16 %v266_v20  ;;  %v276_v43 = vld [vmem:[%s4013_s11 + $0x60] sm:$0xff]   ;;  %v282_v46 = vld [vmem:[%s4013_s11 + $0x78] sm:$0xff]   ;;  %v280_v54 = vld [vmem:[%s4013_s11 + $0x70] sm:$0xff]  }
  0x22   : > { %3228 = vperm.xlu1 %3226, %v4020_v13   ;;  %3274 = vperm.xlu0 %3272, %v4022_v14   ;;  %v4034_v24 = vpack.i.bf16 %v309_v19, %v308_v18  ;;  %v312_v26 = vunpack.c.l.bf16 %v264_v21  ;;  %v313_v27 = vunpack.c.h.bf16 %v264_v21  ;;  %v318_v32 = vunpack.c.l.bf16 %v270_v28  ;;  %v284_v56 = vld [vmem:[%s4013_s11 + $0x80] sm:$0xff]   ;;  %v286_v3 = vld [vmem:[%s4013_s11 + $0x88] sm:$0xff]   ;;  %v288_v16 = vld [vmem:[%s4013_s11 + $0x90] sm:$0xff]  }
  0x23   : > { %v319_v33 = vunpack.c.h.bf16 %v270_v28  ;;  %v316_v34 = vunpack.c.l.bf16 %v268_v29  ;;  %v317_v35 = vunpack.c.h.bf16 %v268_v29  ;;  %v4042_v36 = vpack.i.bf16 %v315_v25, %v314_v23  ;;  %v254_v5 = vld [vmem:[%s4013_s11 + $0x8] sm:$0xff]   ;;  %v292_v23 = vld [vmem:[%s4013_s11 + $0xa0] sm:$0xff]  }
  0x24   : > { %v4044_v37 = vpack.i.bf16 %v313_v27, %v312_v26  ;;  %v322_v38 = vunpack.c.l.bf16 %v274_v30  ;;  %v323_v39 = vunpack.c.h.bf16 %v274_v30  ;;  %v320_v40 = vunpack.c.l.bf16 %v272_v31  ;;  %v294_v26 = vld [vmem:[%s4013_s11 + $0xa8] sm:$0xff]  }
  0x25   : > { %v321_v41 = vunpack.c.h.bf16 %v272_v31  ;;  %v4048_v44 = vpack.i.bf16 %v319_v33, %v318_v32  ;;  %v4050_v45 = vpack.i.bf16 %v317_v35, %v316_v34  ;;  %v326_v48 = vunpack.c.l.bf16 %v278_v42 }
  0x26   : > { %3233 = vperm.xlu1 %3226, %v4026_v17   ;;  %3302 = vperm.xlu0 %3272, %v4020_v13   ;;  %v4055_v47 = vpack.i.bf16 %v323_v39, %v322_v38  ;;  %v327_v49 = vunpack.c.h.bf16 %v278_v42  ;;  %v324_v51 = vunpack.c.l.bf16 %v276_v43  ;;  %v330_v52 = vunpack.c.l.bf16 %v282_v46 }
  0x27   : > { %v4057_v50 = vpack.i.bf16 %v321_v41, %v320_v40  ;;  %v331_v53 = vunpack.c.h.bf16 %v282_v46  ;;  %v325_v55 = vunpack.c.h.bf16 %v276_v43  ;;  %v328_v59 = vunpack.c.l.bf16 %v280_v54 }
  0x28   : > { %v4063_v57 = vpack.i.bf16 %v327_v49, %v326_v48  ;;  %v329_v60 = vunpack.c.h.bf16 %v280_v54  ;;  %v332_v61 = vunpack.c.l.bf16 %v284_v56  ;;  %v333_v62 = vunpack.c.h.bf16 %v284_v56 }
  0x29   : > { %v4065_v58 = vpack.i.bf16 %v331_v53, %v330_v52  ;;  %v4069_v63 = vpack.i.bf16 %v325_v55, %v324_v51  ;;  %v334_v6 = vunpack.c.l.bf16 %v286_v3  ;;  %v335_v7 = vunpack.c.h.bf16 %v286_v3 }
  0x2a   : > { %3238 = vperm.xlu1 %3226, %v4030_v22   ;;  %3330 = vperm.xlu0 %3272, %v4034_v24   ;;  %v4071_v2 = vpack.i.bf16 %v329_v60, %v328_v59  ;;  %v4074_v4 = vpack.i.bf16 %v333_v62, %v332_v61  ;;  %v302_v8 = vunpack.c.l.bf16 %v254_v5  ;;  %v303_v9 = vunpack.c.h.bf16 %v254_v5  ;;  %v298_v62 = vld [vmem:[%s4013_s11 + $0xb8] sm:$0xff]  }
  0x2b   : > { %v4081_v10 = vpack.i.bf16 %v335_v7, %v334_v6  ;;  %v5126_v12 = vmov 18   ;;  %v5128_v15 = vmov 19   ;;  %v336_v18 = vunpack.c.l.bf16 %v288_v16 }
  0x2c   : > { %v3452_v11 = vpack.i.bf16 %v303_v9, %v302_v8  ;;  %v337_v19 = vunpack.c.h.bf16 %v288_v16  ;;  %v341_v25 = vunpack.c.h.bf16 %v292_v23  ;;  %v342_v27 = vunpack.c.l.bf16 %v294_v26 }
  0x2d   : > { %v343_v28 = vunpack.c.h.bf16 %v294_v26  ;;  %v590_v53 = vlaneseq  ;;  %v346_v8 = vunpack.c.l.bf16 %v298_v62  ;;  %v347_v9 = vunpack.c.h.bf16 %v298_v62 }
  0x2e   : > { %3243 = vperm.xlu1 %3226, %v4042_v36   ;;  %3358 = vperm.xlu0 %3272, %v4044_v37  }
  0x2f   : > { %v4141_v29 = vpack.i.bf16 %v343_v28, %v342_v27  ;;  %v591_v56 = vshrl.u32 %v590_v53, 7  ;;  %v4254_v26 = vpack.i.bf16 %v347_v9, %v346_v8  ;;  %v296_v53 = vld [vmem:[%s4013_s11 + $0xb0] sm:$0xff]  }
  0x31   : > { %v592_v60 = vsub.s32 0, %v591_v56  ;;  %v1128_v3 = vsub.s32 2, %v591_v56  ;;  %v1420_v5 = vsub.s32 3, %v591_v56 }
  0x32   : > { %3248 = vperm.xlu1 %3226, %v4048_v44   ;;  %3386 = vperm.xlu0 %3272, %v4050_v45  }
  0x36   : > { %3253 = vperm.xlu1 %3226, %v4055_v47   ;;  %3414 = vperm.xlu0 %3272, %v4057_v50  }
  0x3a   : > { %3258 = vperm.xlu1 %3226, %v4063_v57   ;;  %3442 = vperm.xlu0 %3272, %v4069_v63  }
  0x3e   : > { %3263 = vperm.xlu1 %3226, %v4065_v58   ;;  %3446 = vset.pattern.permute.xlu0 %v5130_v1 }
  0x3f   : > { %3448 = vperm.xlu0 %3446, %v4022_v14  }
  0x42   : > { %3268 = vperm.xlu1 %3226, %v4081_v10  }
  0x43   : > { %3453 = vperm.xlu0 %3446, %v3452_v11  }
  0x46   : > { %3278 = vset.pattern.permute.xlu1 %v5137_v0 }
  0x47   : > { %3280 = vperm.xlu1 %3278, %v3452_v11   ;;  %3458 = vperm.xlu0 %3446, %v4034_v24  }
  0x4b   : > { %3284 = vset.pattern.permute.xlu1 %v5126_v12  ;;  %3463 = vperm.xlu0 %3446, %v4044_v37  }
  0x4c   : > { %3286 = vperm.xlu1 %3284, %v4022_v14  }
  0x4f   : > { %3468 = vperm.xlu0 %3446, %v4050_v45  }
  0x50   : > { %3290 = vset.pattern.permute.xlu1 %v5128_v15 }
  0x51   : > { %3292 = vperm.xlu1 %3290, %v4022_v14   ;;  %v4102_v14 = vpack.i.bf16 %v337_v19, %v336_v18 }
  0x53   : > { %3473 = vperm.xlu0 %3446, %v4057_v50  }
  0x55   : > { %3297 = vperm.xlu1 %3290, %v3452_v11  }
  0x57   : > { %3478 = vperm.xlu0 %3446, %v4069_v63  }
  0x59   : > { %3306 = vset.pattern.permute.xlu1 %v5137_v0 }
  0x5a   : > { %3308 = vperm.xlu1 %3306, %v4026_v17  }
  0x5b   : > { %3483 = vperm.xlu0 %3446, %v4071_v2  }
  0x5e   : > { %3312 = vset.pattern.permute.xlu1 %v5126_v12 }
  0x5f   : > { %3314 = vperm.xlu1 %3312, %v4020_v13   ;;  %3488 = vperm.xlu0 %3446, %v4074_v4  }
  0x63   : > { %3318 = vset.pattern.permute.xlu1 %v5128_v15  ;;  %3562 = vperm.xlu0 %3446, %v4102_v14  }
  0x64   : > { %3320 = vperm.xlu1 %3318, %v4020_v13   ;;  %v290_v13 = vld [vmem:[%s4013_s11 + $0x98] sm:$0xff]  }
  0x65   : > { %v338_v20 = vunpack.c.l.bf16 %v290_v13 }
  0x67   : > { %3566 = vset.pattern.permute.xlu0 %v5126_v12 }
  0x68   : > { %3325 = vperm.xlu1 %3318, %v4026_v17   ;;  %3568 = vperm.xlu0 %3566, %v3452_v11  }
  0x6c   : > { %3334 = vset.pattern.permute.xlu1 %v5137_v0  ;;  %3573 = vperm.xlu0 %3566, %v4026_v17   ;;  %v339_v17 = vunpack.c.h.bf16 %v290_v13 }
  0x6d   : > { %3336 = vperm.xlu1 %3334, %v4030_v22  }
  0x6e   : > { %v4121_v21 = vpack.i.bf16 %v339_v17, %v338_v20 }
  0x70   : > { %3578 = vperm.xlu0 %3566, %v4030_v22  }
  0x71   : > { %3340 = vset.pattern.permute.xlu1 %v5126_v12 }
  0x72   : > { %3342 = vperm.xlu1 %3340, %v4034_v24  }
  0x74   : > { %3583 = vperm.xlu0 %3566, %v4042_v36  }
  0x76   : > { %3346 = vset.pattern.permute.xlu1 %v5128_v15 }
  0x77   : > { %3348 = vperm.xlu1 %3346, %v4034_v24   ;;  %v340_v24 = vunpack.c.l.bf16 %v292_v23 }
  0x78   : > { %3588 = vperm.xlu0 %3566, %v4048_v44  }
  0x7b   : > { %3353 = vperm.xlu1 %3346, %v4030_v22   ;;  %v4132_v22 = vpack.i.bf16 %v341_v25, %v340_v24 }
  0x7c   : > { %3593 = vperm.xlu0 %3566, %v4055_v47  }
  0x7f   : > { %3362 = vset.pattern.permute.xlu1 %v5137_v0 }
  0x80   : > { %3364 = vperm.xlu1 %3362, %v4042_v36   ;;  %3598 = vperm.xlu0 %3566, %v4063_v57  }
  0x84   : > { %3368 = vset.pattern.permute.xlu1 %v5126_v12  ;;  %3603 = vperm.xlu0 %3566, %v4065_v58  }
  0x85   : > { %3370 = vperm.xlu1 %3368, %v4044_v37  }
  0x88   : > { %3608 = vperm.xlu0 %3566, %v4081_v10  }
  0x89   : > { %3374 = vset.pattern.permute.xlu1 %v5128_v15 }
  0x8a   : > { %3376 = vperm.xlu1 %3374, %v4044_v37  }
  0x8c   : > { %3653 = vperm.xlu0 %3566, %v4132_v22  }
  0x8e   : > { %3381 = vperm.xlu1 %3374, %v4042_v36  }
  0x90   : > { %3657 = vset.pattern.permute.xlu0 %v5128_v15 }
  0x91   : > { %3659 = vperm.xlu0 %3657, %v4102_v14  }
  0x92   : > { %3390 = vset.pattern.permute.xlu1 %v5137_v0 }
  0x93   : > { %3392 = vperm.xlu1 %3390, %v4048_v44  }
  0x95   : > { %3676 = vperm.xlu0 %3657, %v4141_v29  }
  0x97   : > { %3396 = vset.pattern.permute.xlu1 %v5126_v12 }
  0x98   : > { %3398 = vperm.xlu1 %3396, %v4050_v45  }
  0x99   : > { %3680 = vset.pattern.permute.xlu0 %v5137_v0 }
  0x9a   : > { %3682 = vperm.xlu0 %3680, %v4071_v2  }
  0x9c   : > { %3402 = vset.pattern.permute.xlu1 %v5128_v15 }
  0x9d   : > { %3404 = vperm.xlu1 %3402, %v4050_v45  }
  0x9e   : > { %3687 = vperm.xlu0 %3680, %v4074_v4  }
  0xa1   : > { %v4153_v30 = vpop.permute.xlu1 %3228  ;;  %3409 = vperm.xlu1 %3402, %v4048_v44   ;;  %v4156_v31 = vpop.permute.xlu0 %3274 }
  0xa2   : > { %3692 = vperm.xlu0 %3680, %v4121_v21   ;;  %v3231_v18 = vunpack.i.h.bf16 %v4153_v30  ;;  %v3230_v19 = vunpack.i.l.bf16 %v4153_v30 }
  0xa5   : > { %v4159_v32 = vpop.permute.xlu1 %3233  ;;  %3418 = vset.pattern.permute.xlu1 %v5137_v0  ;;  %v4162_v33 = vpop.permute.xlu0 %3302 }
  0xa6   : > { %3420 = vperm.xlu1 %3418, %v4055_v47   ;;  %3697 = vperm.xlu0 %3680, %v4132_v22   ;;  %v3305_v7 = vunpack.i.h.bf16 %v4162_v33  ;;  %v3235_v8 = vunpack.i.l.bf16 %v4159_v32 }
  0xa9   : > { %v4166_v34 = vpop.permute.xlu1 %3238  ;;  %v4168_v35 = vpop.permute.xlu0 %3330 }
  0xaa   : > { %3424 = vset.pattern.permute.xlu1 %v5126_v12  ;;  %3702 = vperm.xlu0 %3680, %v4141_v29   ;;  %v3241_v9 = vunpack.i.h.bf16 %v4166_v34 }
  0xab   : > { %3426 = vperm.xlu1 %3424, %v4057_v50  }
  0xad   : > { %v4173_v36 = vpop.permute.xlu1 %3243  ;;  %v4175_v37 = vpop.permute.xlu0 %3358 }
  0xaf   : > { %3430 = vset.pattern.permute.xlu1 %v5128_v15 }
  0xb0   : > { %3432 = vperm.xlu1 %3430, %v4057_v50  }
  0xb1   : > { %v4179_v38 = vpop.permute.xlu1 %3248  ;;  %v4181_v39 = vpop.permute.xlu0 %3386 }
  0xb4   : > { %3437 = vperm.xlu1 %3430, %v4055_v47  }
  0xb5   : > { %v4184_v40 = vpop.permute.xlu1 %3253  ;;  %v4186_v41 = vpop.permute.xlu0 %3414 }
  0xb8   : > { %3492 = vset.pattern.permute.xlu1 %v5137_v0 }
  0xb9   : > { %v4189_v42 = vpop.permute.xlu1 %3258  ;;  %3494 = vperm.xlu1 %3492, %v4063_v57   ;;  %v4192_v43 = vpop.permute.xlu0 %3442 }
  0xbd   : > { %v4194_v44 = vpop.permute.xlu1 %3263  ;;  %3498 = vset.pattern.permute.xlu1 %v5126_v12 }
  0xbe   : > { %5140 = vst [vmem:[#allocation5_spill] sm:$0xff] %v4194_v44  ;;  %3500 = vperm.xlu1 %3498, %v4069_v63   ;;  %v4198_v45 = vpop.permute.xlu0 %3448 }
  0xc1   : > { %v4200_v46 = vpop.permute.xlu1 %3268 }
  0xc2   : > { %5141 = vst [vmem:[#allocation6_spill] sm:$0xff] %v4200_v46  ;;  %3504 = vset.pattern.permute.xlu1 %v5128_v15  ;;  %v4203_v47 = vpop.permute.xlu0 %3453 }
  0xc3   : > { %3506 = vperm.xlu1 %3504, %v4069_v63   ;;  %v348_v63 = vld [vmem:[%s5121_s1] sm:$0xf]  ;;  %v3455_v1 = vunpack.i.l.bf16 %v4203_v47 }
  0xc4   : > { %v4240_v11 = vrot.slane %v348_v63, %v592_v60  ;;  %v4246_v13 = vrot.slane %v348_v63, %v1128_v3  ;;  %v3236_v60 = vunpack.i.h.bf16 %v4159_v32 }
  0xc6   : > { %v4206_v48 = vpop.permute.xlu1 %3280  ;;  %v4208_v49 = vpop.permute.xlu0 %3458  ;;  %v599_v27 = vmul.f32 %v3231_v18, %v4240_v11  ;;  %v598_v28 = vmul.f32 %v3230_v19, %v4240_v11  ;;  %v344_v18 = vunpack.c.l.bf16 %v296_v53  ;;  %v345_v19 = vunpack.c.h.bf16 %v296_v53 }
  0xc7   : > { %3511 = vperm.xlu1 %3504, %v4063_v57   ;;  %v836_v57 = vsub.s32 1, %v591_v56  ;;  %v3277_v56 = vunpack.i.h.bf16 %v4156_v31 }
  0xc9   : > { %v4236_v6 = vrot.slane %v348_v63, %v836_v57  ;;  %v3276_v57 = vunpack.i.l.bf16 %v4156_v31 }
  0xca   : > { %v4211_v50 = vpop.permute.xlu0 %3463 }
  0xcb   : > { %3515 = vset.pattern.permute.xlu1 %v5137_v0  ;;  %v4214_v51 = vpop.permute.xlu1 %3286  ;;  %v843_v24 = vmul.f32 %v3305_v7, %v4236_v6 }
  0xcc   : > { %3517 = vperm.xlu1 %3515, %v4065_v58  }
  0xcd   : > { %v891_v3 = vadd.f32 %v843_v24, %v599_v27  ;;  %v838_v24 = vmul.f32 %v3276_v57, %v4236_v6  ;;  %v3240_v27 = vunpack.i.l.bf16 %v4166_v34  ;;  %v3245_v57 = vunpack.i.l.bf16 %v4173_v36 }
  0xce   : > { %v4220_v54 = vpop.permute.xlu0 %3468  ;;  %v4291_v34 = vpack.i.bf16 %v345_v19, %v344_v18 }
  0xd0   : > { %3521 = vset.pattern.permute.xlu1 %v5126_v12  ;;  %v4218_v52 = vpop.permute.xlu1 %3292 }
  0xd1   : > { %3523 = vperm.xlu1 %3521, %v4071_v2  }
  0xd2   : > { %v4227_v59 = vpop.permute.xlu0 %3473 }
  0xd4   : > { %v4223_v55 = vpop.permute.xlu1 %3297 }
  0xd5   : > { %3527 = vset.pattern.permute.xlu1 %v5128_v15 }
  0xd6   : > { %3529 = vperm.xlu1 %3527, %v4071_v2   ;;  %v3304_v2 = vunpack.i.l.bf16 %v4162_v33  ;;  %v4242_v16 = vpop.permute.xlu0 %3478 }
  0xd8   : > { %v842_v25 = vmul.f32 %v3304_v2, %v4236_v6 }
  0xd9   : > { %v4229_v61 = vpop.permute.xlu1 %3308 }
  0xda   : > { %3534 = vperm.xlu1 %3527, %v4065_v58   ;;  %v4248_v58 = vrot.slane %v348_v63, %v1420_v5  ;;  %v4264_v62 = vpop.permute.xlu0 %3483  ;;  %v890_v5 = vadd.f32 %v842_v25, %v598_v28  ;;  %v4275_v25 = vmul.f32 %v3236_v60, %v4240_v11  ;;  %v3333_v28 = vunpack.i.h.bf16 %v4168_v35 }
  0xdb   : > { %5142 = vst [vmem:[#allocation7_spill] sm:$0xff] %v4264_v62 }
  0xde   : > { %3538 = vset.pattern.permute.xlu1 %v5137_v0  ;;  %v3315_v20 = vpop.permute.xlu1 %3314  ;;  %v4288_v60 = vpop.permute.xlu0 %3488 }
  0xdf   : > { %v3317_v17 = vunpack.i.h.bf16 %v3315_v20  ;;  %v3316_v23 = vunpack.i.l.bf16 %v3315_v20  ;;  %3540 = vperm.xlu1 %3538, %v4081_v10   ;;  %5143 = vst [vmem:[#allocation8_spill] sm:$0xff] %v4288_v60 }
  0xe1   : > { %v1135_v30 = vmul.f32 %v3317_v17, %v4246_v13  ;;  %v1134_v33 = vmul.f32 %v3316_v23, %v4246_v13 }
  0xe3   : > { %3544 = vset.pattern.permute.xlu1 %v5126_v12  ;;  %v3321_v63 = vpop.permute.xlu1 %3320  ;;  %v1182_v31 = vadd.f32 %v1134_v33, %v890_v5  ;;  %v1183_v20 = vadd.f32 %v1135_v30, %v891_v3  ;;  %v839_v12 = vmul.f32 %v3277_v56, %v4236_v6  ;;  %v3332_v33 = vunpack.i.l.bf16 %v4168_v35 }
  0xe4   : > { %v3323_v7 = vunpack.i.h.bf16 %v3321_v63  ;;  %v3322_v2 = vunpack.i.l.bf16 %v3321_v63  ;;  %3546 = vperm.xlu1 %3544, %v4074_v4   ;;  %v4284_v63 = vmul.f32 %v3235_v8, %v4240_v11  ;;  %v3246_v56 = vunpack.i.h.bf16 %v4173_v36 }
  0xe5   : > { %v4294_v3 = vmul.f32 %v3241_v9, %v4240_v11  ;;  %v3361_v35 = vunpack.i.h.bf16 %v4175_v37  ;;  %v3360_v5 = vunpack.i.l.bf16 %v4175_v37  ;;  %v4304_v36 = vmul.f32 %v3240_v27, %v4240_v11 }
  0xe6   : > { %v1427_v17 = vmul.f32 %v3323_v7, %v4248_v58  ;;  %v1426_v23 = vmul.f32 %v3322_v2, %v4248_v58  ;;  %v4301_v7 = vld [vmem:[%s5122_s2] ss:$0 sm:$0xff]  ;;  %v3451_v2 = vunpack.i.h.bf16 %v4198_v45  ;;  %v847_v9 = vmul.f32 %v3333_v28, %v4236_v6 }
  0xe7   : > { %v4278_v32 = vpop.permute.xlu1 %3325  ;;  %v846_v18 = vmul.f32 %v3332_v33, %v4236_v6  ;;  %v3450_v37 = vunpack.i.l.bf16 %v4198_v45  ;;  %v4324_v27 = vmul.f32 %v3361_v35, %v4236_v6  ;;  %v4327_v28 = vmul.f32 %v3360_v5, %v4236_v6 }
  0xe8   : > { %v1474_v30 = vadd.f32 %v1426_v23, %v1182_v31  ;;  %v1475_v53 = vadd.f32 %v1427_v17, %v1183_v20  ;;  %3550 = vset.pattern.permute.xlu1 %v5128_v15  ;;  %v4315_v31 = vmul.f32 %v3246_v56, %v4240_v11  ;;  %v4318_v20 = vmul.f32 %v3245_v57, %v4240_v11  ;;  %v4333_v56 = vpop.permute.xlu0 %3562 }
  0xe9   : > { %3552 = vperm.xlu1 %3550, %v4074_v4   ;;  %v3251_v17 = vunpack.i.h.bf16 %v4179_v38  ;;  %v3250_v23 = vunpack.i.l.bf16 %v4179_v38  ;;  %v3461_v33 = vunpack.i.h.bf16 %v4208_v49  ;;  %5146 = vst [vmem:[#allocation11_spill] sm:$0xff] %v4333_v56  ;;  %v3460_v35 = vunpack.i.l.bf16 %v4208_v49 }
  0xea   : > { %v1528_v4 = vadd.f32 %v4301_v7, %v1474_v30  ;;  %v1529_v8 = vadd.f32 %v4301_v7, %v1475_v53  ;;  %5144 = vst [vmem:[#allocation9_spill] sm:$0xff] %v4315_v31  ;;  %5145 = vst [vmem:[#allocation10_spill] sm:$0xff] %v4318_v20  ;;  %v595_v53 = vmul.f32 %v3451_v2, %v4240_v11  ;;  %v3456_v30 = vunpack.i.h.bf16 %v4203_v47 }
  0xeb   : > { %v4338_v5 = vmul.f32 %v3251_v17, %v4240_v11  ;;  %v4341_v15 = vmul.f32 %v3250_v23, %v4240_v11  ;;  %v3288_v2 = vunpack.i.l.bf16 %v4214_v51  ;;  %v3289_v49 = vunpack.i.h.bf16 %v4214_v51 }
  0xec   : > { %v4312_v19 = vpop.permute.xlu1 %3336  ;;  %v1624_v57 = vmul.f32 0.2, %v1528_v4  ;;  %v1625_v38 = vmul.f32 0.2, %v1529_v8  ;;  %vm1576_vm0 = vcmp.gt.f32.partialorder %v1528_v4, 0.0  ;;  %vm1577_vm1 = vcmp.gt.f32.partialorder %v1529_v8, 0.0 }
  0xed   : > { %3557 = vperm.xlu1 %3550, %v4081_v10   ;;  %v594_v10 = vmul.f32 %v3450_v37, %v4240_v11  ;;  %5147 = vst [vmem:[#allocation12_spill] sm:$0xff] %v4338_v5  ;;  %5148 = vst [vmem:[#allocation13_spill] sm:$0xff] %v4341_v15  ;;  %v603_v37 = vmul.f32 %v3461_v33, %v4240_v11  ;;  %v3294_v56 = vunpack.i.l.bf16 %v4218_v52  ;;  %v3569_v15 = vpop.permute.xlu0 %3568 }
  0xee   : > { %v1672_v60 = vsel %vm1576_vm0, %v1528_v4, %v1624_v57  ;;  %v1673_v46 = vsel %vm1577_vm1, %v1529_v8, %v1625_v38  ;;  %v887_v44 = vadd.f32 %v839_v12, %v595_v53  ;;  %v602_v5 = vmul.f32 %v3460_v35, %v4240_v11 }
  0xef   : > { %v886_v62 = vadd.f32 %v838_v24, %v594_v10  ;;  %v597_v47 = vmul.f32 %v3456_v30, %v4240_v11  ;;  %v1130_v33 = vmul.f32 %v3288_v2, %v4246_v13  ;;  %v1718_v31 = vpack.c.bf16 %v1673_v46, %v1672_v60 }
  0xf0   : > { %v596_v20 = vmul.f32 %v3455_v1, %v4240_v11  ;;  %v1131_v4 = vmul.f32 %v3289_v49, %v4246_v13  ;;  %v5149_v24 = vmov 16   ;;  %v895_v30 = vadd.f32 %v847_v9, %v603_v37 }
  0xf1   : > { %3612 = vset.pattern.permute.xlu1 %v5137_v0  ;;  %v3343_v45 = vpop.permute.xlu1 %3342  ;;  %v3295_v0 = vunpack.i.h.bf16 %v4218_v52  ;;  %v3283_v52 = vunpack.i.h.bf16 %v4206_v48  ;;  %v1422_v53 = vmul.f32 %v3294_v56, %v4248_v58  ;;  %1888 = vrot.lane.b32.xlu0 %v1718_v31, %s3915_s16  ;;  %v894_v1 = vadd.f32 %v846_v18, %v602_v5 }
  0xf2   : > { %3614 = vperm.xlu1 %3612, %v4102_v14   ;;  %v3345_v17 = vunpack.i.h.bf16 %v3343_v45  ;;  %v3344_v23 = vunpack.i.l.bf16 %v3343_v45  ;;  %v3282_v45 = vunpack.i.l.bf16 %v4206_v48  ;;  %v3570_v57 = vunpack.i.l.bf16 %v3569_v15 }
  0xf3   : > { %v1423_v60 = vmul.f32 %v3295_v0, %v4248_v58  ;;  %v1178_v10 = vadd.f32 %v1130_v33, %v886_v62  ;;  %v3571_v35 = vunpack.i.h.bf16 %v3569_v15  ;;  %v1179_v9 = vadd.f32 %v1131_v4, %v887_v44 }
  0xf4   : > { %v1139_v51 = vmul.f32 %v3345_v17, %v4246_v13  ;;  %v1138_v12 = vmul.f32 %v3344_v23, %v4246_v13  ;;  %v840_v48 = vmul.f32 %v3282_v45, %v4236_v6  ;;  %v841_v17 = vmul.f32 %v3283_v52, %v4236_v6 }
  0xf5   : > { %v1470_v18 = vadd.f32 %v1422_v53, %v1178_v10  ;;  %3725 = vperm.xlu0 %3680, %v4254_v26   ;;  %v5150_v5 = vmov 18   ;;  %v5151_v15 = vunpack.i.h.bf16 %v4181_v39  ;;  %v1471_v23 = vadd.f32 %v1423_v60, %v1179_v9 }
  0xf6   : > { %3618 = vset.pattern.permute.xlu1 %v5149_v24  ;;  %v3349_v8 = vpop.permute.xlu1 %3348  ;;  %v1187_v2 = vadd.f32 %v1139_v51, %v895_v30  ;;  %v1186_v56 = vadd.f32 %v1138_v12, %v894_v1  ;;  %v1132_v44 = vmul.f32 %v3570_v57, %v4246_v13  ;;  %v5152_v51 = vunpack.i.l.bf16 %v4181_v39 }
  0xf7   : > { %v3351_v46 = vunpack.i.h.bf16 %v3349_v8  ;;  %3620 = vperm.xlu1 %3618, %v4121_v21   ;;  %v3350_v38 = vunpack.i.l.bf16 %v3349_v8  ;;  %v4377_v62 = vmul.f32 %v5151_v15, %v4236_v6  ;;  %v3256_v4 = vunpack.i.h.bf16 %v4184_v40 }
  0xf8   : > { %v4384_v45 = vmul.f32 %v5152_v51, %v4236_v6  ;;  %v1133_v12 = vmul.f32 %v3571_v35, %v4246_v13  ;;  %v3255_v52 = vunpack.i.l.bf16 %v4184_v40  ;;  %v888_v30 = vadd.f32 %v840_v48, %v596_v20 }
  0xf9   : > { %v1431_v49 = vmul.f32 %v3351_v46, %v4248_v58  ;;  %v1430_v37 = vmul.f32 %v3350_v38, %v4248_v58  ;;  %v3299_v53 = vunpack.i.l.bf16 %v4223_v55  ;;  %v889_v1 = vadd.f32 %v841_v17, %v597_v47  ;;  %3735 = vset.pattern.permute.xlu0 %v5150_v5 }
  0xfa   : > { %v4369_v31 = vpop.permute.xlu1 %3353  ;;  %v3300_v39 = vunpack.i.h.bf16 %v4223_v55  ;;  %v3417_v38 = vunpack.i.h.bf16 %v4186_v41  ;;  %v1525_v10 = vadd.f32 %v4301_v7, %v1471_v23  ;;  %v1180_v40 = vadd.f32 %v1132_v44, %v888_v30  ;;  %3737 = vperm.xlu0 %3735, %v4254_v26  }
  0xfb   : > { %v1479_v0 = vadd.f32 %v1431_v49, %v1187_v2  ;;  %3624 = vset.pattern.permute.xlu1 %v5150_v5  ;;  %v1478_v33 = vadd.f32 %v1430_v37, %v1186_v56  ;;  %v3416_v20 = vunpack.i.l.bf16 %v4186_v41  ;;  %v1181_v47 = vadd.f32 %v1133_v12, %v889_v1 }
  0xfc   : > { %3626 = vperm.xlu1 %3624, %v4102_v14   ;;  %v1524_v14 = vadd.f32 %v4301_v7, %v1470_v18  ;;  %v3261_v35 = vunpack.i.h.bf16 %v4189_v42  ;;  %v3466_v2 = vunpack.i.h.bf16 %v4211_v50  ;;  %v3465_v49 = vunpack.i.l.bf16 %v4211_v50 }
  0xfd   : > { %v1533_v8 = vadd.f32 %v4301_v7, %v1479_v0  ;;  %v1532_v46 = vadd.f32 %v4301_v7, %v1478_v33  ;;  %v1424_v48 = vmul.f32 %v3299_v53, %v4248_v58  ;;  %v1425_v9 = vmul.f32 %v3300_v39, %v4248_v58 }
  0xfe   : > { %vm1572_vm4 = vcmp.gt.f32.partialorder %v1524_v14, 0.0  ;;  %v5153_v18 = vmov 19   ;;  %vm1573_vm5 = vcmp.gt.f32.partialorder %v1525_v10, 0.0  ;;  %v1620_v0 = vmul.f32 0.2, %v1524_v14 }
  0xff   : > { %v4395_v60 = vpop.permute.xlu1 %3364  ;;  %v1629_v57 = vmul.f32 0.2, %v1533_v8  ;;  %vm1581_vm2 = vcmp.gt.f32.partialorder %v1533_v8, 0.0  ;;  %vm1580_vm3 = vcmp.gt.f32.partialorder %v1532_v46, 0.0  ;;  %v1628_v55 = vmul.f32 0.2, %v1532_v46 }
 0x100   : > { %3631 = vperm.xlu1 %3624, %v4121_v21   ;;  %v1472_v17 = vadd.f32 %v1424_v48, %v1180_v40  ;;  %v1621_v15 = vmul.f32 0.2, %v1525_v10  ;;  %v1473_v23 = vadd.f32 %v1425_v9, %v1181_v47  ;;  %v4410_v50 = vmul.f32 %v3256_v4, %v4240_v11  ;;  %v3574_v47 = vpop.permute.xlu0 %3573 }
 0x101   : > { %v1676_v56 = vsel %vm1580_vm3, %v1532_v46, %v1628_v55  ;;  %v1677_v37 = vsel %vm1581_vm2, %v1533_v8, %v1629_v57  ;;  %v4413_v12 = vmul.f32 %v3255_v52, %v4240_v11  ;;  %v607_v8 = vmul.f32 %v3466_v2, %v4240_v11 }
 0x102   : > { %v1720_v51 = vpack.c.bf16 %v1677_v37, %v1676_v56  ;;  %v606_v30 = vmul.f32 %v3465_v49, %v4240_v11  ;;  %v4418_v53 = vmul.f32 %v3417_v38, %v4236_v6  ;;  %v4421_v46 = vmul.f32 %v3416_v20, %v4236_v6 }
 0x103   : > { %v3260_v1 = vunpack.i.l.bf16 %v4189_v42  ;;  %v1668_v39 = vsel %vm1572_vm4, %v1524_v14, %v1620_v0  ;;  %v1669_v57 = vsel %vm1573_vm5, %v1525_v10, %v1621_v15  ;;  %v4431_v38 = vmul.f32 %v3261_v35, %v4240_v11 }
 0x104   : > { %3635 = vset.pattern.permute.xlu1 %v5153_v18  ;;  %v3371_v41 = vpop.permute.xlu1 %3370  ;;  %1892 = vrot.lane.b32.xlu0 %v1720_v51, %s3915_s16  ;;  %v3445_v40 = vunpack.i.h.bf16 %v4192_v43  ;;  %v1526_v20 = vadd.f32 %v4301_v7, %v1472_v17  ;;  %v1527_v42 = vadd.f32 %v4301_v7, %v1473_v23  ;;  %v898_v2 = vadd.f32 %v4327_v28, %v606_v30  ;;  %v3757_v30 = vld [vmem:[%s5123_s3 + $0x8] sm:$0xff]  }
 0x105   : > { %v3373_v44 = vunpack.i.h.bf16 %v3371_v41  ;;  %v3372_v33 = vunpack.i.l.bf16 %v3371_v41  ;;  %3637 = vperm.xlu1 %3635, %v4121_v21   ;;  %v3444_v21 = vunpack.i.l.bf16 %v4192_v43  ;;  %v899_v49 = vadd.f32 %v4324_v27, %v607_v8  ;;  %v3756_v8 = vld [vmem:[%s5123_s3] sm:$0xff]  }
 0x106   : > { %v4441_v10 = vmul.f32 %v3260_v1, %v4240_v11  ;;  %v3310_v9 = vunpack.i.l.bf16 %v4229_v61  ;;  %v1716_v56 = vpack.c.bf16 %v1669_v57, %v1668_v39  ;;  %v3311_v27 = vunpack.i.h.bf16 %v4229_v61  ;;  %3055 = vmatprep.subr.bf16.mxu0 %v3756_v8 }
 0x107   : > { %v1143_v4 = vmul.f32 %v3373_v44, %v4246_v13  ;;  %v1142_v52 = vmul.f32 %v3372_v33, %v4246_v13  ;;  %v4444_v35 = vmul.f32 %v3444_v21, %v4236_v6  ;;  %v3575_v0 = vunpack.i.l.bf16 %v3574_v47  ;;  %3056 = vmatpush3.bf16.msra.mxu0 %v3756_v8 }
 0x108   : > { %v1622_v23 = vmul.f32 0.2, %v1526_v20  ;;  %v1623_v44 = vmul.f32 0.2, %v1527_v42  ;;  %vm1574_vm6 = vcmp.gt.f32.partialorder %v1526_v20, 0.0  ;;  %vm1575_vm7 = vcmp.gt.f32.partialorder %v1527_v42, 0.0  ;;  %3057 = vmatprep.subr.bf16.mxu0 %v3757_v30 }
 0x109   : > { %3641 = vset.pattern.permute.xlu1 %v5149_v24  ;;  %v3377_v55 = vpop.permute.xlu1 %3376  ;;  %v1190_v37 = vadd.f32 %v1142_v52, %v898_v2  ;;  %v1191_v17 = vadd.f32 %v1143_v4, %v899_v49  ;;  %v3471_v61 = vunpack.i.h.bf16 %v4220_v54  ;;  %v3470_v1 = vunpack.i.l.bf16 %v4220_v54  ;;  %v4462_v4 = vpop.permute.xlu0 %3578 }
 0x10a   : > { %v3379_v14 = vunpack.i.h.bf16 %v3377_v55  ;;  %v3378_v48 = vunpack.i.l.bf16 %v3377_v55  ;;  %3643 = vperm.xlu1 %3641, %v4132_v22   ;;  %v844_v21 = vmul.f32 %v3310_v9, %v4236_v6  ;;  %v3476_v52 = vunpack.i.h.bf16 %v4227_v59 }
 0x10b   : > { %v3576_v39 = vunpack.i.h.bf16 %v3574_v47  ;;  %v845_v2 = vmul.f32 %v3311_v27, %v4236_v6  ;;  %v1136_v49 = vmul.f32 %v3575_v0, %v4246_v13  ;;  %v611_v0 = vmul.f32 %v3471_v61, %v4240_v11  ;;  %3058 = vmatpush3.bf16.msra.mxu0 %v3757_v30 }
 0x10c   : > { %v1435_v41 = vmul.f32 %v3379_v14, %v4248_v58  ;;  %v1434_v28 = vmul.f32 %v3378_v48, %v4248_v58  ;;  %v1670_v14 = vsel %vm1574_vm6, %v1526_v20, %v1622_v23  ;;  %v1671_v48 = vsel %vm1575_vm7, %v1527_v42, %v1623_v44 }
 0x10d   : > { %v4450_v15 = vpop.permute.xlu1 %3381  ;;  %v1137_v20 = vmul.f32 %v3576_v39, %v4246_v13  ;;  %v1717_v42 = vpack.c.bf16 %v1671_v48, %v1670_v14  ;;  %v610_v23 = vmul.f32 %v3470_v1, %v4240_v11  ;;  %v3338_v44 = vunpack.i.l.bf16 %v4312_v19 }
 0x10e   : > { %v1482_v33 = vadd.f32 %v1434_v28, %v1190_v37  ;;  %v1483_v51 = vadd.f32 %v1435_v41, %v1191_v17  ;;  %1884 = vrot.lane.b32.xlu1 %v1716_v56, %s3915_s16  ;;  %v3475_v56 = vunpack.i.l.bf16 %v4227_v59  ;;  %v892_v37 = vadd.f32 %v844_v21, %v4284_v63  ;;  %v3759_v21 = vld [vmem:[%s5123_s3 + $0x10] sm:$0xff]  }
 0x10f   : > { %v3327_v17 = vunpack.i.l.bf16 %v4278_v32  ;;  %v3339_v41 = vunpack.i.h.bf16 %v4312_v19  ;;  %v893_v59 = vadd.f32 %v845_v2, %v4275_v25  ;;  %v3328_v63 = vunpack.i.h.bf16 %v4278_v32  ;;  %3059 = vmatprep.subr.bf16.mxu0 %v3759_v21 }
 0x110   : > { %v1536_v57 = vadd.f32 %v4301_v7, %v1482_v33  ;;  %v1537_v55 = vadd.f32 %v4301_v7, %v1483_v51  ;;  %v4480_v33 = vpop.permute.xlu0 %3583  ;;  %v1184_v51 = vadd.f32 %v1136_v49, %v892_v37  ;;  %v615_v61 = vmul.f32 %v3476_v52, %v4240_v11  ;;  %3060 = vmatpush3.bf16.msra.mxu0 %v3759_v21 }
 0x111   : > { %v614_v1 = vmul.f32 %v3475_v56, %v4240_v11  ;;  %v3480_v19 = vunpack.i.l.bf16 %v4242_v16  ;;  %v1428_v30 = vmul.f32 %v3327_v17, %v4248_v58  ;;  %v1185_v25 = vadd.f32 %v1137_v20, %v893_v59 }
 0x112   : > { %v4469_v54 = vpop.permute.xlu1 %3392  ;;  %3648 = vperm.xlu1 %3641, %v4141_v29   ;;  %vm1584_vm8 = vcmp.gt.f32.partialorder %v1536_v57, 0.0  ;;  %vm1585_vm9 = vcmp.gt.f32.partialorder %v1537_v55, 0.0  ;;  %v1632_v9 = vmul.f32 0.2, %v1536_v57  ;;  %v1633_v47 = vmul.f32 0.2, %v1537_v55 }
 0x113   : > { %v849_v32 = vmul.f32 %v3339_v41, %v4236_v6  ;;  %v902_v2 = vadd.f32 %v4384_v45, %v610_v23  ;;  %v848_v52 = vmul.f32 %v3338_v44, %v4236_v6  ;;  %v3581_v49 = vunpack.i.h.bf16 %v4462_v4 }
 0x114   : > { %v1680_v28 = vsel %vm1584_vm8, %v1536_v57, %v1632_v9  ;;  %v1681_v27 = vsel %vm1585_vm9, %v1537_v55, %v1633_v47  ;;  %v903_v14 = vadd.f32 %v4377_v62, %v611_v0  ;;  %v1429_v48 = vmul.f32 %v3328_v63, %v4248_v58  ;;  %v4508_v45 = vpop.permute.xlu0 %3588 }
 0x115   : > { %v1722_v8 = vpack.c.bf16 %v1681_v27, %v1680_v28  ;;  %v1476_v9 = vadd.f32 %v1428_v30, %v1184_v51  ;;  %v3580_v47 = vunpack.i.l.bf16 %v4462_v4  ;;  %v4503_v56 = vadd.f32 %v4421_v46, %v614_v1 }
 0x116   : > { %1886 = vrot.lane.b32.xlu1 %v1717_v42, %s3915_s16  ;;  %v4506_v37 = vadd.f32 %v4418_v53, %v615_v61  ;;  %v3481_v62 = vunpack.i.h.bf16 %v4242_v16  ;;  %v4514_v20 = vmul.f32 %v3480_v19, %v4240_v11  ;;  %v1477_v4 = vadd.f32 %v1429_v48, %v1185_v25 }
 0x117   : > { %v3399_v39 = vpop.permute.xlu1 %3398  ;;  %3663 = vset.pattern.permute.xlu1 %v5150_v5  ;;  %1896 = vrot.lane.b32.xlu0 %v1722_v8, %s3915_s16  ;;  %v896_v46 = vadd.f32 %v848_v52, %v4304_v36  ;;  %v1141_v53 = vmul.f32 %v3581_v49, %v4246_v13  ;;  %v1530_v0 = vadd.f32 %v4301_v7, %v1476_v9  ;;  %v3586_v44 = vunpack.i.h.bf16 %v4480_v33 }
 0x118   : > { %v3401_v57 = vunpack.i.h.bf16 %v3399_v39  ;;  %v3400_v55 = vunpack.i.l.bf16 %v3399_v39  ;;  %v1140_v23 = vmul.f32 %v3580_v47, %v4246_v13  ;;  %v3585_v59 = vunpack.i.l.bf16 %v4480_v33  ;;  %v3594_v30 = vpop.permute.xlu0 %3593 }
 0x119   : > { %v1531_v8 = vadd.f32 %v4301_v7, %v1477_v4  ;;  %v3591_v21 = vunpack.i.h.bf16 %v4508_v45  ;;  %v3356_v61 = vunpack.i.h.bf16 %v4369_v31  ;;  %v3355_v1 = vunpack.i.l.bf16 %v4369_v31 }
 0x11a   : > { %3665 = vperm.xlu1 %3663, %v4141_v29   ;;  %v1147_v17 = vmul.f32 %v3401_v57, %v4246_v13  ;;  %v1146_v41 = vmul.f32 %v3400_v55, %v4246_v13  ;;  %v897_v29 = vadd.f32 %v849_v32, %v4294_v3  ;;  %v3366_v39 = vunpack.i.l.bf16 %v4395_v60 }
 0x11b   : > { %v1188_v57 = vadd.f32 %v1140_v23, %v896_v46  ;;  %v1145_v55 = vmul.f32 %v3586_v44, %v4246_v13  ;;  %v3590_v52 = vunpack.i.l.bf16 %v4508_v45  ;;  %vm1578_vm10 = vcmp.gt.f32.partialorder %v1530_v0, 0.0 }
 0x11c   : > { %v3405_v42 = vpop.permute.xlu1 %3404  ;;  %v1194_v63 = vadd.f32 %v1146_v41, %v902_v2  ;;  %v1195_v51 = vadd.f32 %v1147_v17, %v903_v14  ;;  %v1189_v33 = vadd.f32 %v1141_v53, %v897_v29  ;;  %v3367_v2 = vunpack.i.h.bf16 %v4395_v60  ;;  %v4551_v53 = vpop.permute.xlu0 %3598 }
 0x11d   : > { %v3407_v28 = vunpack.i.h.bf16 %v3405_v42  ;;  %v3406_v27 = vunpack.i.l.bf16 %v3405_v42  ;;  %v4542_v14 = vmul.f32 %v3591_v21, %v4246_v13  ;;  %v1433_v48 = vmul.f32 %v3356_v61, %v4248_v58 }
 0x11e   : > { %3669 = vset.pattern.permute.xlu1 %v5153_v18  ;;  %v1432_v9 = vmul.f32 %v3355_v1, %v4248_v58  ;;  %vm1579_vm11 = vcmp.gt.f32.partialorder %v1531_v8, 0.0  ;;  %v852_v60 = vmul.f32 %v3366_v39, %v4236_v6  ;;  %v1626_v45 = vmul.f32 0.2, %v1530_v0  ;;  %v5156_v39 = vld [vmem:[#allocation9_spill] sm:$0xff] }
 0x11f   : > { %v1439_v3 = vmul.f32 %v3407_v28, %v4248_v58  ;;  %v1438_v36 = vmul.f32 %v3406_v27, %v4248_v58  ;;  %3671 = vperm.xlu1 %3669, %v4132_v22   ;;  %v1144_v22 = vmul.f32 %v3585_v59, %v4246_v13  ;;  %v853_v17 = vmul.f32 %v3367_v2, %v4236_v6 }
 0x120   : > { %v4531_v19 = vpop.permute.xlu1 %3409  ;;  %v1627_v29 = vmul.f32 0.2, %v1531_v8  ;;  %v3596_v42 = vunpack.i.h.bf16 %v3594_v30  ;;  %v3595_v46 = vunpack.i.l.bf16 %v3594_v30  ;;  %v3383_v28 = vunpack.i.l.bf16 %v4450_v15 }
 0x121   : > { %v1486_v25 = vadd.f32 %v1438_v36, %v1194_v63  ;;  %v1487_v32 = vadd.f32 %v1439_v3, %v1195_v51  ;;  %v3394_v27 = vunpack.i.l.bf16 %v4469_v54  ;;  %v1480_v23 = vadd.f32 %v1432_v9, %v1188_v57  ;;  %v5155_v36 = vld [vmem:[#allocation10_spill] sm:$0xff]  ;;  %v4576_v9 = vpop.permute.xlu0 %3603 }
 0x122   : > { %v3384_v44 = vunpack.i.h.bf16 %v4450_v15  ;;  %v5154_v59 = vmov 17   ;;  %v1481_v3 = vadd.f32 %v1433_v48, %v1189_v33  ;;  %v900_v21 = vadd.f32 %v852_v60, %v5155_v36 }
 0x123   : > { %v1540_v49 = vadd.f32 %v4301_v7, %v1486_v25  ;;  %v1541_v31 = vadd.f32 %v4301_v7, %v1487_v32  ;;  %3706 = vset.pattern.permute.xlu1 %v5149_v24  ;;  %v3395_v61 = vunpack.i.h.bf16 %v4469_v54  ;;  %v1148_v30 = vmul.f32 %v3590_v52, %v4246_v13 }
 0x124   : > { %3708 = vperm.xlu1 %3706, %v4291_v34   ;;  %v901_v25 = vadd.f32 %v853_v17, %v5156_v39  ;;  %v1674_v57 = vsel %vm1578_vm10, %v1530_v0, %v1626_v45  ;;  %v1675_v15 = vsel %vm1579_vm11, %v1531_v8, %v1627_v29  ;;  %v1436_v2 = vmul.f32 %v3383_v28, %v4248_v58  ;;  %v5157_v28 = vld [vmem:[#allocation13_spill] sm:$0xff] }
 0x125   : > { %v4548_v47 = vpop.permute.xlu1 %3420  ;;  %vm1588_vm12 = vcmp.gt.f32.partialorder %v1540_v49, 0.0  ;;  %vm1589_vm13 = vcmp.gt.f32.partialorder %v1541_v31, 0.0  ;;  %v1636_v41 = vmul.f32 0.2, %v1540_v49  ;;  %v1637_v4 = vmul.f32 0.2, %v1541_v31 }
 0x126   : > { %v856_v33 = vmul.f32 %v3394_v27, %v4236_v6  ;;  %v1534_v54 = vadd.f32 %v4301_v7, %v1480_v23  ;;  %v4569_v48 = vmul.f32 %v3596_v42, %v4246_v13  ;;  %v4572_v52 = vmul.f32 %v3595_v46, %v4246_v13 }
 0x127   : > { %v1684_v63 = vsel %vm1588_vm12, %v1540_v49, %v1636_v41  ;;  %v1685_v51 = vsel %vm1589_vm13, %v1541_v31, %v1637_v4  ;;  %v1437_v0 = vmul.f32 %v3384_v44, %v4248_v58  ;;  %v1535_v8 = vadd.f32 %v4301_v7, %v1481_v3 }
 0x128   : > { %3712 = vset.pattern.permute.xlu1 %v5154_v59  ;;  %v1724_v1 = vpack.c.bf16 %v1685_v51, %v1684_v63  ;;  %v1192_v60 = vadd.f32 %v1144_v22, %v900_v21  ;;  %v857_v45 = vmul.f32 %v3395_v61, %v4236_v6  ;;  %v3411_v17 = vunpack.i.l.bf16 %v4531_v19  ;;  %v5158_v51 = vld [vmem:[#allocation12_spill] sm:$0xff] }
 0x129   : > { %3714 = vperm.xlu1 %3712, %v4291_v34   ;;  %v1193_v41 = vadd.f32 %v1145_v55, %v901_v25  ;;  %v1719_v42 = vpack.c.bf16 %v1675_v15, %v1674_v57  ;;  %v904_v27 = vadd.f32 %v856_v33, %v5157_v28  ;;  %v3412_v23 = vunpack.i.h.bf16 %v4531_v19  ;;  %v4595_v25 = vpop.permute.xlu0 %3608 }
 0x12a   : > { %v3427_v32 = vpop.permute.xlu1 %3426  ;;  %1900 = vrot.lane.b32.xlu0 %v1724_v1, %s3915_s16  ;;  %v1484_v46 = vadd.f32 %v1436_v2, %v1192_v60  ;;  %v3422_v22 = vunpack.i.l.bf16 %v4548_v47  ;;  %v3423_v63 = vunpack.i.h.bf16 %v4548_v47  ;;  %v905_v3 = vadd.f32 %v857_v45, %v5158_v51 }
 0x12b   : > { %v3429_v49 = vunpack.i.h.bf16 %v3427_v32  ;;  %v3428_v31 = vunpack.i.l.bf16 %v3427_v32  ;;  %v1485_v59 = vadd.f32 %v1437_v0, %v1193_v41  ;;  %v1440_v36 = vmul.f32 %v3411_v17, %v4248_v58 }
 0x12c   : > { %vm1582_vm14 = vcmp.gt.f32.partialorder %v1534_v54, 0.0  ;;  %v1630_v21 = vmul.f32 0.2, %v1534_v54  ;;  %v1538_v47 = vadd.f32 %v4301_v7, %v1484_v46  ;;  %v1441_v32 = vmul.f32 %v3412_v23, %v4248_v58 }
 0x12d   : > { %3718 = vset.pattern.permute.xlu1 %v5149_v24  ;;  %v1151_v4 = vmul.f32 %v3429_v49, %v4246_v13  ;;  %v1150_v29 = vmul.f32 %v3428_v31, %v4246_v13  ;;  %v1196_v57 = vadd.f32 %v1148_v30, %v904_v27  ;;  %v860_v15 = vmul.f32 %v3422_v22, %v4236_v6  ;;  %v4610_v46 = vpop.permute.xlu0 %3653 }
 0x12e   : > { %3720 = vperm.xlu1 %3718, %v4254_v26   ;;  %v1197_v31 = vadd.f32 %v4542_v14, %v905_v3  ;;  %vm1583_vm15 = vcmp.gt.f32.partialorder %v1535_v8, 0.0  ;;  %v1631_v60 = vmul.f32 0.2, %v1535_v8  ;;  %vm1586_vm0 = vcmp.gt.f32.partialorder %v1538_v47, 0.0 }
 0x12f   : > { %v3433_v44 = vpop.permute.xlu1 %3432  ;;  %v1198_v61 = vadd.f32 %v1150_v29, %v4503_v56  ;;  %v1199_v1 = vadd.f32 %v1151_v4, %v4506_v37  ;;  %v1539_v56 = vadd.f32 %v4301_v7, %v1485_v59  ;;  %v861_v37 = vmul.f32 %v3423_v63, %v4236_v6 }
 0x130   : > { %v3435_v24 = vunpack.i.h.bf16 %v3433_v44  ;;  %v3434_v55 = vunpack.i.l.bf16 %v3433_v44  ;;  %v1488_v0 = vadd.f32 %v1440_v36, %v1196_v57  ;;  %v908_v4 = vadd.f32 %v860_v15, %v4413_v12 }
 0x131   : > { %v1678_v29 = vsel %vm1582_vm14, %v1534_v54, %v1630_v21  ;;  %vm1587_vm3 = vcmp.gt.f32.partialorder %v1539_v56, 0.0  ;;  %v1679_v23 = vsel %vm1583_vm15, %v1535_v8, %v1631_v60  ;;  %v1634_v22 = vmul.f32 0.2, %v1538_v47 }
 0x132   : > { %v1443_v19 = vmul.f32 %v3435_v24, %v4248_v58  ;;  %v1442_v39 = vmul.f32 %v3434_v55, %v4248_v58  ;;  %1890 = vrot.lane.b32.xlu1 %v1719_v42, %s3915_s16  ;;  %v909_v42 = vadd.f32 %v861_v37, %v4410_v50  ;;  %v1542_v44 = vadd.f32 %v4301_v7, %v1488_v0 }
 0x133   : > { %v3438_v2 = vpop.permute.xlu1 %3437  ;;  %3729 = vset.pattern.permute.xlu1 %v5150_v5  ;;  %v1489_v5 = vadd.f32 %v1441_v32, %v1197_v31  ;;  %v1635_v50 = vmul.f32 0.2, %v1539_v56  ;;  %v1200_v63 = vadd.f32 %v4572_v52, %v908_v4  ;;  %v863_v21 = vmul.f32 %v3445_v40, %v4236_v6 }
 0x134   : > { %v1490_v33 = vadd.f32 %v1442_v39, %v1198_v61  ;;  %v1491_v49 = vadd.f32 %v1443_v19, %v1199_v1  ;;  %v3440_v17 = vunpack.i.h.bf16 %v3438_v2  ;;  %v3439_v41 = vunpack.i.l.bf16 %v3438_v2  ;;  %v4632_v1 = vpop.permute.xlu0 %3659 }
 0x135   : > { %v1543_v59 = vadd.f32 %v4301_v7, %v1489_v5  ;;  %v1201_v55 = vadd.f32 %v4569_v48, %v909_v42  ;;  %v619_v61 = vmul.f32 %v3481_v62, %v4240_v11  ;;  %v3601_v52 = vunpack.i.h.bf16 %v4551_v53 }
 0x136   : > { %v1544_v45 = vadd.f32 %v4301_v7, %v1490_v33  ;;  %v1545_v30 = vadd.f32 %v4301_v7, %v1491_v49  ;;  %3731 = vperm.xlu1 %3729, %v4291_v34   ;;  %v1445_v12 = vmul.f32 %v3440_v17, %v4248_v58  ;;  %v1444_v54 = vmul.f32 %v3439_v41, %v4248_v58 }
 0x137   : > { %v3600_v43 = vunpack.i.l.bf16 %v4551_v53  ;;  %v1721_v16 = vpack.c.bf16 %v1679_v23, %v1678_v29  ;;  %v1682_v40 = vsel %vm1586_vm0, %v1538_v47, %v1634_v22  ;;  %v1638_v62 = vmul.f32 0.2, %v1542_v44 }
 0x138   : > { %v3495_v14 = vpop.permute.xlu1 %3494  ;;  %vm1592_vm1 = vcmp.gt.f32.partialorder %v1544_v45, 0.0  ;;  %vm1593_vm2 = vcmp.gt.f32.partialorder %v1545_v30, 0.0  ;;  %v1640_v28 = vmul.f32 0.2, %v1544_v45  ;;  %v1641_v27 = vmul.f32 0.2, %v1545_v30  ;;  %v4647_v0 = vpop.permute.xlu0 %3676 }
 0x139   : > { %v3497_v51 = vunpack.i.h.bf16 %v3495_v14  ;;  %v3496_v3 = vunpack.i.l.bf16 %v3495_v14  ;;  %v1492_v48 = vadd.f32 %v1444_v54, %v1200_v63  ;;  %v1493_v39 = vadd.f32 %v1445_v12, %v1201_v55 }
 0x13a   : > { %3741 = vset.pattern.permute.xlu1 %v5153_v18  ;;  %v1688_v24 = vsel %vm1592_vm1, %v1544_v45, %v1640_v28  ;;  %v1689_v8 = vsel %vm1593_vm2, %v1545_v30, %v1641_v27  ;;  %vm1590_vm4 = vcmp.gt.f32.partialorder %v1542_v44, 0.0  ;;  %vm1591_vm5 = vcmp.gt.f32.partialorder %v1543_v59, 0.0 }
 0x13b   : > { %3743 = vperm.xlu1 %3741, %v4291_v34   ;;  %v1726_v36 = vpack.c.bf16 %v1689_v8, %v1688_v24  ;;  %v910_v34 = vadd.f32 %v4444_v35, %v4514_v20  ;;  %v1683_v35 = vsel %vm1587_vm3, %v1539_v56, %v1635_v50  ;;  %v1639_v20 = vmul.f32 0.2, %v1543_v59 }
 0x13c   : > { %v865_v15 = vmul.f32 %v3497_v51, %v4236_v6  ;;  %v864_v2 = vmul.f32 %v3496_v3, %v4236_v6  ;;  %v911_v53 = vadd.f32 %v863_v21, %v619_v61  ;;  %v1546_v49 = vadd.f32 %v4301_v7, %v1492_v48 }
 0x13d   : > { %v3501_v19 = vpop.permute.xlu1 %3500  ;;  %1904 = vrot.lane.b32.xlu0 %v1726_v36, %s3915_s16  ;;  %v1547_v47 = vadd.f32 %v4301_v7, %v1493_v39  ;;  %v1156_v31 = vmul.f32 %v3600_v43, %v4246_v13  ;;  %v1723_v30 = vpack.c.bf16 %v1683_v35, %v1682_v40  ;;  %v1686_v5 = vsel %vm1590_vm4, %v1542_v44, %v1638_v62 }
 0x13e   : > { %v3503_v32 = vunpack.i.h.bf16 %v3501_v19  ;;  %v3502_v57 = vunpack.i.l.bf16 %v3501_v19  ;;  %v913_v17 = vadd.f32 %v865_v15, %v4431_v38  ;;  %v912_v41 = vadd.f32 %v864_v2, %v4441_v10 }
 0x13f   : > { %3748 = vperm.xlu1 %3741, %v4254_v26   ;;  %v1157_v26 = vmul.f32 %v3601_v52, %v4246_v13  ;;  %v1687_v4 = vsel %vm1591_vm5, %v1543_v59, %v1639_v20  ;;  %v1642_v27 = vmul.f32 0.2, %v1546_v49  ;;  %v1643_v23 = vmul.f32 0.2, %v1547_v47  ;;  %v3683_v59 = vpop.permute.xlu0 %3682  ;;  %v5159_v52 = vld [vmem:[#allocation5_spill] sm:$0xff] }
 0x140   : > { %v1155_v37 = vmul.f32 %v3503_v32, %v4246_v13  ;;  %v1154_v33 = vmul.f32 %v3502_v57, %v4246_v13  ;;  %vm1594_vm6 = vcmp.gt.f32.partialorder %v1546_v49, 0.0  ;;  %vm1595_vm7 = vcmp.gt.f32.partialorder %v1547_v47, 0.0 }
 0x141   : > { %v1204_v38 = vadd.f32 %v1156_v31, %v912_v41  ;;  %v1205_v10 = vadd.f32 %v1157_v26, %v913_v17  ;;  %v1725_v44 = vpack.c.bf16 %v1687_v4, %v1686_v5  ;;  %v1690_v3 = vsel %vm1594_vm6, %v1546_v49, %v1642_v27  ;;  %v5160_v26 = vld [vmem:[#allocation7_spill] sm:$0xff] }
 0x142   : > { %v3507_v56 = vpop.permute.xlu1 %3506  ;;  %v1202_v29 = vadd.f32 %v1154_v33, %v910_v34  ;;  %v1203_v42 = vadd.f32 %v1155_v37, %v911_v53  ;;  %v1691_v36 = vsel %vm1595_vm7, %v1547_v47, %v1643_v23  ;;  %v3266_v19 = vunpack.i.h.bf16 %v5159_v52 }
 0x143   : > { %v3509_v60 = vunpack.i.h.bf16 %v3507_v56  ;;  %v3508_v45 = vunpack.i.l.bf16 %v3507_v56  ;;  %1894 = vrot.lane.b32.xlu1 %v1721_v16, %s3915_s16  ;;  %v3685_v48 = vunpack.i.h.bf16 %v3683_v59  ;;  %v3684_v57 = vunpack.i.l.bf16 %v3683_v59 }
 0x144   : > { %v1727_v40 = vpack.c.bf16 %v1691_v36, %v1690_v3  ;;  %v3265_v53 = vunpack.i.l.bf16 %v5159_v52  ;;  %v3486_v49 = vunpack.i.h.bf16 %v5160_v26  ;;  %v3485_v47 = vunpack.i.l.bf16 %v5160_v26 }
 0x145   : > { %v1447_v14 = vmul.f32 %v3509_v60, %v4248_v58  ;;  %v1446_v28 = vmul.f32 %v3508_v45, %v4248_v58  ;;  %v866_v17 = vmul.f32 %v3684_v57, %v4236_v6  ;;  %v625_v27 = vmul.f32 %v3266_v19, %v4240_v11 }
 0x146   : > { %v3512_v22 = vpop.permute.xlu1 %3511  ;;  %v624_v23 = vmul.f32 %v3265_v53, %v4240_v11  ;;  %vm1932_vm6 = vcmask 130048   ;;  %vm2032_vm7 = vcmask 392192  }
 0x147   : > { %v1494_v12 = vadd.f32 %v1446_v28, %v1202_v29  ;;  %v1495_v54 = vadd.f32 %v1447_v14, %v1203_v42  ;;  %v3514_v50 = vunpack.i.h.bf16 %v3512_v22  ;;  %v3513_v63 = vunpack.i.l.bf16 %v3512_v22  ;;  %1898 = vrot.lane.b32.xlu1 %v1723_v30, %s3915_s16 }
 0x148   : > { %v867_v30 = vmul.f32 %v3685_v48, %v4236_v6  ;;  %v623_v29 = vmul.f32 %v3486_v49, %v4240_v11  ;;  %v622_v42 = vmul.f32 %v3485_v47, %v4240_v11  ;;  %v3606_v22 = vunpack.i.h.bf16 %v4576_v9 }
 0x149   : > { %v1548_v24 = vadd.f32 %v4301_v7, %v1494_v12  ;;  %v1549_v8 = vadd.f32 %v4301_v7, %v1495_v54  ;;  %v1449_v55 = vmul.f32 %v3514_v50, %v4248_v58  ;;  %v1448_v51 = vmul.f32 %v3513_v63, %v4248_v58 }
 0x14a   : > { %v3605_v12 = vunpack.i.l.bf16 %v4576_v9  ;;  %v914_v50 = vadd.f32 %v866_v17, %v622_v42  ;;  %v915_v63 = vadd.f32 %v867_v30, %v623_v29  ;;  %v1161_v3 = vmul.f32 %v3606_v22, %v4246_v13 }
 0x14b   : > { %v1496_v21 = vadd.f32 %v1448_v51, %v1204_v38  ;;  %v1497_v61 = vadd.f32 %v1449_v55, %v1205_v10  ;;  %v3518_v34 = vpop.permute.xlu1 %3517  ;;  %1902 = vrot.lane.b32.xlu1 %v1725_v44, %s3915_s16  ;;  %vm1596_vm8 = vcmp.gt.f32.partialorder %v1548_v24, 0.0  ;;  %vm1597_vm9 = vcmp.gt.f32.partialorder %v1549_v8, 0.0 }
 0x14c   : > { %v1644_v39 = vmul.f32 0.2, %v1548_v24  ;;  %v1645_v32 = vmul.f32 0.2, %v1549_v8  ;;  %v3520_v35 = vunpack.i.h.bf16 %v3518_v34  ;;  %v3519_v62 = vunpack.i.l.bf16 %v3518_v34 }
 0x14d   : > { %v1550_v43 = vadd.f32 %v4301_v7, %v1496_v21  ;;  %v1551_v16 = vadd.f32 %v4301_v7, %v1497_v61  ;;  %v1160_v36 = vmul.f32 %v3605_v12, %v4246_v13 }
 0x14e   : > { %v1692_v20 = vsel %vm1596_vm8, %v1548_v24, %v1644_v39  ;;  %v1693_v15 = vsel %vm1597_vm9, %v1549_v8, %v1645_v32  ;;  %v869_v5 = vmul.f32 %v3520_v35, %v4236_v6  ;;  %v868_v4 = vmul.f32 %v3519_v62, %v4236_v6  ;;  %v4688_v39 = vld [vmem:[%s5122_s2] ss:$0 sm:$0xff] }
 0x14f   : > { %v1646_v2 = vmul.f32 0.2, %v1550_v43  ;;  %v1647_v37 = vmul.f32 0.2, %v1551_v16  ;;  %1906 = vrot.lane.b32.xlu1 %v1727_v40, %s3915_s16  ;;  %v1728_v33 = vpack.c.bf16 %v1693_v15, %v1692_v20  ;;  %vm1598_vm10 = vcmp.gt.f32.partialorder %v1550_v43, 0.0  ;;  %v3688_v40 = vpop.permute.xlu0 %3687  ;;  %v5161_v15 = vld [vmem:[#allocation6_spill] sm:$0xff] }
 0x150   : > { %v3524_v56 = vpop.permute.xlu1 %3523  ;;  %vm1599_vm11 = vcmp.gt.f32.partialorder %v1551_v16, 0.0  ;;  %v917_v44 = vadd.f32 %v869_v5, %v625_v27  ;;  %v916_v59 = vadd.f32 %v868_v4, %v624_v23  ;;  %v3690_v53 = vunpack.i.h.bf16 %v3688_v40  ;;  %v5162_v5 = vld [vmem:[#allocation8_spill] sm:$0xff] }
 0x151   : > { %v3526_v7 = vunpack.i.h.bf16 %v3524_v56  ;;  %v3525_v31 = vunpack.i.l.bf16 %v3524_v56  ;;  %1908 = vrot.lane.b32.xlu0 %v1728_v33, %s3915_s16  ;;  %v1694_v60 = vsel %vm1598_vm10, %v1550_v43, %v1646_v2  ;;  %v1695_v45 = vsel %vm1599_vm11, %v1551_v16, %v1647_v37 }
 0x152   : > { %v1729_v41 = vpack.c.bf16 %v1695_v45, %v1694_v60  ;;  %v1208_v19 = vadd.f32 %v1160_v36, %v916_v59  ;;  %v1209_v48 = vadd.f32 %v1161_v3, %v917_v44  ;;  %v3271_v2 = vunpack.i.h.bf16 %v5161_v15 }
 0x153   : > { %v1159_v14 = vmul.f32 %v3526_v7, %v4246_v13  ;;  %v1158_v28 = vmul.f32 %v3525_v31, %v4246_v13  ;;  %v3689_v26 = vunpack.i.l.bf16 %v3688_v40  ;;  %v3491_v4 = vunpack.i.h.bf16 %v5162_v5 }
 0x154   : > { %1910 = vrot.lane.b32.xlu1 %v1729_v41, %s3915_s16  ;;  %v3270_v41 = vunpack.i.l.bf16 %v5161_v15  ;;  %v3490_v29 = vunpack.i.l.bf16 %v5162_v5  ;;  %v871_v22 = vmul.f32 %v3690_v53, %v4236_v6 }
 0x155   : > { %v3530_v54 = vpop.permute.xlu1 %3529  ;;  %v1206_v24 = vadd.f32 %v1158_v28, %v914_v50  ;;  %v1207_v8 = vadd.f32 %v1159_v14, %v915_v63  ;;  %v870_v12 = vmul.f32 %v3689_v26, %v4236_v6 }
 0x156   : > { %v3532_v38 = vunpack.i.h.bf16 %v3530_v54  ;;  %v3531_v10 = vunpack.i.l.bf16 %v3530_v54 }
 0x158   : > { %v1451_v55 = vmul.f32 %v3532_v38, %v4248_v58  ;;  %v1450_v51 = vmul.f32 %v3531_v10, %v4248_v58  ;;  %v627_v38 = vmul.f32 %v3491_v4, %v4240_v11  ;;  %v626_v10 = vmul.f32 %v3490_v29, %v4240_v11 }
 0x159   : > { %v3535_v21 = vpop.permute.xlu1 %3534 }
 0x15a   : > { %v1498_v61 = vadd.f32 %v1450_v51, %v1206_v24  ;;  %v1499_v9 = vadd.f32 %v1451_v55, %v1207_v8  ;;  %v3537_v34 = vunpack.i.h.bf16 %v3535_v21  ;;  %v3536_v52 = vunpack.i.l.bf16 %v3535_v21 }
 0x15b   : > { %v629_v24 = vmul.f32 %v3271_v2, %v4240_v11  ;;  %v628_v8 = vmul.f32 %v3270_v41, %v4240_v11  ;;  %v3611_v55 = vunpack.i.h.bf16 %v4595_v25  ;;  %v3610_v51 = vunpack.i.l.bf16 %v4595_v25 }
 0x15c   : > { %v1552_v32 = vadd.f32 %v4688_v39, %v1498_v61  ;;  %v1553_v57 = vadd.f32 %v4688_v39, %v1499_v9  ;;  %v1453_v43 = vmul.f32 %v3537_v34, %v4248_v58  ;;  %v1452_v16 = vmul.f32 %v3536_v52, %v4248_v58 }
 0x15d   : > { %v918_v36 = vadd.f32 %v870_v12, %v626_v10  ;;  %v919_v21 = vadd.f32 %v871_v22, %v627_v38 }
 0x15e   : > { %v1500_v35 = vadd.f32 %v1452_v16, %v1208_v19  ;;  %v1501_v62 = vadd.f32 %v1453_v43, %v1209_v48  ;;  %v3541_v20 = vpop.permute.xlu1 %3540  ;;  %vm1600_vm12 = vcmp.gt.f32.partialorder %v1552_v32, 0.0  ;;  %vm1601_vm13 = vcmp.gt.f32.partialorder %v1553_v57, 0.0 }
 0x15f   : > { %v1648_v37 = vmul.f32 0.2, %v1552_v32  ;;  %v1649_v33 = vmul.f32 0.2, %v1553_v57  ;;  %v3543_v56 = vunpack.i.h.bf16 %v3541_v20  ;;  %v3542_v7 = vunpack.i.l.bf16 %v3541_v20 }
 0x160   : > { %v1554_v49 = vadd.f32 %v4688_v39, %v1500_v35  ;;  %v1555_v47 = vadd.f32 %v4688_v39, %v1501_v62  ;;  %v1165_v43 = vmul.f32 %v3611_v55, %v4246_v13  ;;  %v1164_v16 = vmul.f32 %v3610_v51, %v4246_v13 }
 0x161   : > { %v1696_v31 = vsel %vm1600_vm12, %v1552_v32, %v1648_v37  ;;  %v1697_v60 = vsel %vm1601_vm13, %v1553_v57, %v1649_v33  ;;  %v873_v50 = vmul.f32 %v3543_v56, %v4236_v6  ;;  %v872_v63 = vmul.f32 %v3542_v7, %v4236_v6 }
 0x162   : > { %v1650_v45 = vmul.f32 0.2, %v1554_v49  ;;  %v1651_v30 = vmul.f32 0.2, %v1555_v47  ;;  %v1730_v17 = vpack.c.bf16 %v1697_v60, %v1696_v31  ;;  %vm1602_vm14 = vcmp.gt.f32.partialorder %v1554_v49, 0.0 }
 0x163   : > { %v3547_v42 = vpop.permute.xlu1 %3546  ;;  %vm1603_vm15 = vcmp.gt.f32.partialorder %v1555_v47, 0.0  ;;  %v921_v34 = vadd.f32 %v873_v50, %v629_v24  ;;  %v920_v52 = vadd.f32 %v872_v63, %v628_v8  ;;  %v3693_v24 = vpop.permute.xlu0 %3692 }
 0x164   : > { %v3549_v14 = vunpack.i.h.bf16 %v3547_v42  ;;  %v3548_v28 = vunpack.i.l.bf16 %v3547_v42  ;;  %1912 = vrot.lane.b32.xlu0 %v1730_v17, %s3915_s16  ;;  %v1698_v27 = vsel %vm1602_vm14, %v1554_v49, %v1650_v45  ;;  %v1699_v23 = vsel %vm1603_vm15, %v1555_v47, %v1651_v30 }
 0x165   : > { %v1731_v54 = vpack.c.bf16 %v1699_v23, %v1698_v27  ;;  %v1212_v15 = vadd.f32 %v1164_v16, %v920_v52  ;;  %v1213_v2 = vadd.f32 %v1165_v43, %v921_v34  ;;  %v3695_v55 = vunpack.i.h.bf16 %v3693_v24 }
 0x166   : > { %v1163_v44 = vmul.f32 %v3549_v14, %v4246_v13  ;;  %v1162_v59 = vmul.f32 %v3548_v28, %v4246_v13  ;;  %v5163_v28 = vld [vmem:[#allocation11_spill] sm:$0xff]  ;;  %v3694_v51 = vunpack.i.l.bf16 %v3693_v24 }
 0x167   : > { %1914 = vrot.lane.b32.xlu1 %v1731_v54, %s3915_s16  ;;  %v3565_v27 = vunpack.i.h.bf16 %v5163_v28  ;;  %v3564_v23 = vunpack.i.l.bf16 %v5163_v28 }
 0x168   : > { %v3553_v3 = vpop.permute.xlu1 %3552  ;;  %v1210_v19 = vadd.f32 %v1162_v59, %v918_v36  ;;  %v1211_v48 = vadd.f32 %v1163_v44, %v919_v21  ;;  %v3662_v44 = vunpack.i.h.bf16 %v4632_v1  ;;  %v3661_v59 = vunpack.i.l.bf16 %v4632_v1 }
 0x169   : > { %v3555_v61 = vunpack.i.h.bf16 %v3553_v3  ;;  %v3554_v9 = vunpack.i.l.bf16 %v3553_v3  ;;  %v631_v38 = vmul.f32 %v3565_v27, %v4240_v11  ;;  %v630_v10 = vmul.f32 %v3564_v23, %v4240_v11 }
 0x16a   : > { %v877_v1 = vmul.f32 %v3695_v55, %v4236_v6  ;;  %v876_v43 = vmul.f32 %v3694_v51, %v4236_v6  ;;  %v3808_v51 = vld [vmem:[%s4013_s11 + $0x8] sm:$0xff]  }
 0x16b   : > { %v1455_v32 = vmul.f32 %v3555_v61, %v4248_v58  ;;  %v1454_v57 = vmul.f32 %v3554_v9, %v4248_v58 }
 0x16c   : > { %v3558_v40 = vpop.permute.xlu1 %3557 }
 0x16d   : > { %v1502_v35 = vadd.f32 %v1454_v57, %v1210_v19  ;;  %v1503_v25 = vadd.f32 %v1455_v32, %v1211_v48  ;;  %v3560_v62 = vunpack.i.h.bf16 %v3558_v40  ;;  %v3559_v20 = vunpack.i.l.bf16 %v3558_v40 }
 0x16e   : > { %v1459_v48 = vmul.f32 %v3662_v44, %v4248_v58  ;;  %v1458_v32 = vmul.f32 %v3661_v59, %v4248_v58 }
 0x16f   : > { %v1556_v37 = vadd.f32 %v4688_v39, %v1502_v35  ;;  %v1557_v33 = vadd.f32 %v4688_v39, %v1503_v25  ;;  %v1457_v53 = vmul.f32 %v3560_v62, %v4248_v58  ;;  %v1456_v26 = vmul.f32 %v3559_v20, %v4248_v58 }
 0x171   : > { %v1504_v49 = vadd.f32 %v1456_v26, %v1212_v15  ;;  %v1505_v47 = vadd.f32 %v1457_v53, %v1213_v2  ;;  %v3615_v56 = vpop.permute.xlu1 %3614  ;;  %vm1604_vm0 = vcmp.gt.f32.partialorder %v1556_v37, 0.0  ;;  %vm1605_vm1 = vcmp.gt.f32.partialorder %v1557_v33, 0.0 }
 0x172   : > { %v1652_v7 = vmul.f32 0.2, %v1556_v37  ;;  %v1653_v31 = vmul.f32 0.2, %v1557_v33  ;;  %v3617_v29 = vunpack.i.h.bf16 %v3615_v56  ;;  %v3616_v42 = vunpack.i.l.bf16 %v3615_v56 }
 0x173   : > { %v1558_v60 = vadd.f32 %v4688_v39, %v1504_v49  ;;  %v1559_v45 = vadd.f32 %v4688_v39, %v1505_v47 }
 0x174   : > { %v1700_v30 = vsel %vm1604_vm0, %v1556_v37, %v1652_v7  ;;  %v1701_v17 = vsel %vm1605_vm1, %v1557_v33, %v1653_v31  ;;  %v875_v50 = vmul.f32 %v3617_v29, %v4236_v6  ;;  %v874_v63 = vmul.f32 %v3616_v42, %v4236_v6 }
 0x175   : > { %v1654_v41 = vmul.f32 0.2, %v1558_v60  ;;  %v1655_v5 = vmul.f32 0.2, %v1559_v45  ;;  %v1732_v4 = vpack.c.bf16 %v1701_v17, %v1700_v30  ;;  %vm1606_vm2 = vcmp.gt.f32.partialorder %v1558_v60, 0.0 }
 0x176   : > { %v3621_v14 = vpop.permute.xlu1 %3620  ;;  %vm1607_vm3 = vcmp.gt.f32.partialorder %v1559_v45, 0.0  ;;  %v922_v9 = vadd.f32 %v874_v63, %v630_v10  ;;  %v923_v34 = vadd.f32 %v875_v50, %v631_v38 }
 0x177   : > { %1916 = vrot.lane.b32.xlu0 %v1732_v4, %s3915_s16  ;;  %v1702_v22 = vsel %vm1606_vm2, %v1558_v60, %v1654_v41  ;;  %v1703_v12 = vsel %vm1607_vm3, %v1559_v45, %v1655_v5  ;;  %v3623_v21 = vunpack.i.h.bf16 %v3621_v14  ;;  %v3622_v61 = vunpack.i.l.bf16 %v3621_v14  ;;  %v3698_v4 = vpop.permute.xlu0 %3697 }
 0x178   : > { %v1733_v54 = vpack.c.bf16 %v1703_v12, %v1702_v22  ;;  %v3807_v22 = vld [vmem:[%s4013_s11] sm:$0xff]   ;;  %vm2397_vm2 = vcmask 261120  }
 0x179   : > { %v633_v35 = vmul.f32 %v3623_v21, %v4240_v11  ;;  %v632_v25 = vmul.f32 %v3622_v61, %v4240_v11 }
 0x17a   : > { %1918 = vrot.lane.b32.xlu1 %v1733_v54, %s3915_s16 }
 0x17b   : > { %v3627_v8 = vpop.permute.xlu1 %3626  ;;  %v924_v47 = vadd.f32 %v876_v43, %v632_v25  ;;  %v925_v56 = vadd.f32 %v877_v1, %v633_v35  ;;  %v3703_v10 = vpop.permute.xlu0 %3702  ;;  %v3699_v1 = vunpack.i.l.bf16 %v3698_v4  ;;  %v3679_v35 = vunpack.i.h.bf16 %v4647_v0 }
 0x17c   : > { %v3629_v3 = vunpack.i.h.bf16 %v3627_v8  ;;  %v3628_v36 = vunpack.i.l.bf16 %v3627_v8  ;;  %v3678_v25 = vunpack.i.l.bf16 %v4647_v0 }
 0x17e   : > { %v1167_v52 = vmul.f32 %v3629_v3, %v4246_v13  ;;  %v1166_v19 = vmul.f32 %v3628_v36, %v4246_v13  ;;  %v3809_v3 = vld [vmem:[%s4013_s11 + $0x10] sm:$0xff]  }
 0x17f   : > { %v3632_v57 = vpop.permute.xlu1 %3631  ;;  %v1889_v36 = vpop.permute.xlu0 %1888 }
 0x180   : > { %v1214_v16 = vadd.f32 %v1166_v19, %v922_v9  ;;  %v1215_v40 = vadd.f32 %v1167_v52, %v923_v34  ;;  %v3634_v62 = vunpack.i.h.bf16 %v3632_v57  ;;  %v3633_v20 = vunpack.i.l.bf16 %v3632_v57 }
 0x181   : > { %v3705_v19 = vunpack.i.h.bf16 %v3703_v10  ;;  %v3700_v57 = vunpack.i.h.bf16 %v3698_v4  ;;  %v1941_v43 = vsel %vm1932_vm6, %v3809_v3, %v1889_v36 }
 0x182   : > { %v1506_v15 = vadd.f32 %v1458_v32, %v1214_v16  ;;  %v1507_v2 = vadd.f32 %v1459_v48, %v1215_v40  ;;  %v1169_v37 = vmul.f32 %v3634_v62, %v4246_v13  ;;  %v1168_v33 = vmul.f32 %v3633_v20, %v4246_v13 }
 0x183   : > { %v3704_v48 = vunpack.i.l.bf16 %v3703_v10 }
 0x184   : > { %v3638_v53 = vpop.permute.xlu1 %3637  ;;  %v1560_v26 = vadd.f32 %v4688_v39, %v1506_v15  ;;  %v1561_v49 = vadd.f32 %v4688_v39, %v1507_v2  ;;  %v1216_v30 = vadd.f32 %v1168_v33, %v924_v47  ;;  %v1217_v17 = vadd.f32 %v1169_v37, %v925_v56 }
 0x185   : > { %v3640_v7 = vunpack.i.h.bf16 %v3638_v53  ;;  %v3639_v31 = vunpack.i.l.bf16 %v3638_v53  ;;  %v881_v2 = vmul.f32 %v3705_v19, %v4236_v6  ;;  %v880_v37 = vmul.f32 %v3704_v48, %v4236_v6 }
 0x186   : > { %vm1608_vm4 = vcmp.gt.f32.partialorder %v1560_v26, 0.0  ;;  %vm1609_vm5 = vcmp.gt.f32.partialorder %v1561_v49, 0.0  ;;  %v1656_v60 = vmul.f32 0.2, %v1560_v26  ;;  %v1657_v45 = vmul.f32 0.2, %v1561_v49 }
 0x187   : > { %v1461_v41 = vmul.f32 %v3640_v7, %v4248_v58  ;;  %v1460_v5 = vmul.f32 %v3639_v31, %v4248_v58  ;;  %v879_v47 = vmul.f32 %v3700_v57, %v4236_v6  ;;  %v878_v56 = vmul.f32 %v3699_v1, %v4236_v6 }
 0x188   : > { %v1704_v29 = vsel %vm1608_vm4, %v1560_v26, %v1656_v60  ;;  %v1705_v42 = vsel %vm1609_vm5, %v1561_v49, %v1657_v45  ;;  %v3656_v26 = vunpack.i.h.bf16 %v4610_v46  ;;  %v3655_v49 = vunpack.i.l.bf16 %v4610_v46 }
 0x189   : > { %v1508_v14 = vadd.f32 %v1460_v5, %v1216_v30  ;;  %v1509_v28 = vadd.f32 %v1461_v41, %v1217_v17  ;;  %v3644_v27 = vpop.permute.xlu1 %3643  ;;  %v1734_v23 = vpack.c.bf16 %v1705_v42, %v1704_v29  ;;  %v1465_v17 = vmul.f32 %v3679_v35, %v4248_v58 }
 0x18a   : > { %v3646_v9 = vunpack.i.h.bf16 %v3644_v27  ;;  %v3645_v34 = vunpack.i.l.bf16 %v3644_v27  ;;  %v1464_v41 = vmul.f32 %v3678_v25, %v4248_v58  ;;  %v1171_v46 = vmul.f32 %v3656_v26, %v4246_v13 }
 0x18b   : > { %v1562_v12 = vadd.f32 %v4688_v39, %v1508_v14  ;;  %v1563_v54 = vadd.f32 %v4688_v39, %v1509_v28  ;;  %1920 = vrot.lane.b32.xlu0 %v1734_v23, %s3915_s16  ;;  %v1170_v42 = vmul.f32 %v3655_v49, %v4246_v13 }
 0x18c   : > { %v635_v62 = vmul.f32 %v3646_v9, %v4240_v11  ;;  %v634_v20 = vmul.f32 %v3645_v34, %v4240_v11 }
 0x18d   : > { %v1658_v50 = vmul.f32 0.2, %v1562_v12  ;;  %v1659_v63 = vmul.f32 0.2, %v1563_v54  ;;  %v1885_v38 = vpop.permute.xlu1 %1884  ;;  %vm1610_vm8 = vcmp.gt.f32.partialorder %v1562_v12, 0.0  ;;  %vm1611_vm9 = vcmp.gt.f32.partialorder %v1563_v54, 0.0 }
 0x18e   : > { %v1935_v44 = vsel %vm1932_vm6, %v3807_v22, %v1885_v38  ;;  %v926_v45 = vadd.f32 %v878_v56, %v634_v20  ;;  %v927_v30 = vadd.f32 %v879_v47, %v635_v62 }
 0x18f   : > { %3061 = vmatprep.mubr.msk.bf16.mxu0 %vm2032_vm7, %v1935_v44  ;;  %v1706_v59 = vsel %vm1610_vm8, %v1562_v12, %v1658_v50  ;;  %v1707_v24 = vsel %vm1611_vm9, %v1563_v54, %v1659_v63 }
 0x190   : > { %v1735_v8 = vpack.c.bf16 %v1707_v24, %v1706_v59  ;;  %v1218_v22 = vadd.f32 %v1170_v42, %v926_v45  ;;  %v1219_v12 = vadd.f32 %v1171_v46, %v927_v30  ;;  %v3726_v24 = vpop.permute.xlu0 %3725 }
 0x191   : > { %v3649_v55 = vpop.permute.xlu1 %3648  ;;  %v3728_v49 = vunpack.i.h.bf16 %v3726_v24  ;;  %v3727_v47 = vunpack.i.l.bf16 %v3726_v24 }
 0x192   : > { %1922 = vrot.lane.b32.xlu1 %v1735_v8, %s3915_s16  ;;  %v3651_v21 = vunpack.i.h.bf16 %v3649_v55  ;;  %v3650_v61 = vunpack.i.l.bf16 %v3649_v55 }
 0x193   : > { %v885_v46 = vmul.f32 %v3728_v49, %v4236_v6  ;;  %v884_v42 = vmul.f32 %v3727_v47, %v4236_v6 }
 0x194   : > { %v637_v16 = vmul.f32 %v3651_v21, %v4240_v11  ;;  %v636_v40 = vmul.f32 %v3650_v61, %v4240_v11  ;;  %v3738_v19 = vpop.permute.xlu0 %3737 }
 0x195   : > { %v1887_v52 = vpop.permute.xlu1 %1886  ;;  %v3739_v45 = vunpack.i.l.bf16 %v3738_v19 }
 0x196   : > { %v1938_v32 = vsel %vm1932_vm6, %v3808_v51, %v1887_v52  ;;  %v929_v0 = vadd.f32 %v881_v2, %v637_v16  ;;  %v928_v7 = vadd.f32 %v880_v37, %v636_v40  ;;  %v3811_v16 = vld [vmem:[%s4013_s11 + $0x20] sm:$0xff]  }
 0x197   : > { %3062 = vmatmul.mubr.msk.bf16.vlgmr.msra.gmra.mrb[0].mxu0 %vm2032_vm7, %v1938_v32 }
 0x198   : > { %3065 = vmatprep.mubr.msk.bf16.mxu0 %vm2032_vm7, %v1941_v43  ;;  %v3810_v43 = vld [vmem:[%s4013_s11 + $0x18] sm:$0xff]   ;;  %v1893_v40 = vpop.permute.xlu0 %1892 }
 0x199   : > { %v3666_v15 = vpop.permute.xlu1 %3665  ;;  %v1947_v62 = vsel %vm1932_vm6, %v3811_v16, %v1893_v40 }
 0x19a   : > { %v3668_v33 = vunpack.i.h.bf16 %v3666_v15  ;;  %v3667_v53 = vunpack.i.l.bf16 %v3666_v15 }
 0x19c   : > { %v1173_v31 = vmul.f32 %v3668_v33, %v4246_v13  ;;  %v1172_v60 = vmul.f32 %v3667_v53, %v4246_v13 }
 0x19e   : > { %v1220_v5 = vadd.f32 %v1172_v60, %v928_v7  ;;  %v1221_v4 = vadd.f32 %v1173_v31, %v929_v0  ;;  %v3672_v29 = vpop.permute.xlu1 %3671  ;;  %v3740_v60 = vunpack.i.h.bf16 %v3738_v19 }
 0x19f   : > { %v3674_v14 = vunpack.i.h.bf16 %v3672_v29  ;;  %v3673_v28 = vunpack.i.l.bf16 %v3672_v29 }
 0x1a0   : > { %v1512_v27 = vadd.f32 %v1464_v41, %v1220_v5  ;;  %v1513_v23 = vadd.f32 %v1465_v17, %v1221_v4 }
 0x1a1   : > { %v1463_v54 = vmul.f32 %v3674_v14, %v4248_v58  ;;  %v1462_v50 = vmul.f32 %v3673_v28, %v4248_v58 }
 0x1a2   : > { %v1566_v63 = vadd.f32 %v4688_v39, %v1512_v27  ;;  %v1567_v38 = vadd.f32 %v4688_v39, %v1513_v23 }
 0x1a3   : > { %v1511_v10 = vadd.f32 %v1463_v54, %v1219_v12  ;;  %v1510_v44 = vadd.f32 %v1462_v50, %v1218_v22  ;;  %v3709_v59 = vpop.permute.xlu1 %3708  ;;  %v1177_v12 = vmul.f32 %v3740_v60, %v4246_v13  ;;  %v1176_v54 = vmul.f32 %v3739_v45, %v4246_v13 }
 0x1a4   : > { %vm1614_vm10 = vcmp.gt.f32.partialorder %v1566_v63, 0.0  ;;  %vm1615_vm11 = vcmp.gt.f32.partialorder %v1567_v38, 0.0  ;;  %v1662_v51 = vmul.f32 0.2, %v1566_v63  ;;  %v1663_v3 = vmul.f32 0.2, %v1567_v38 }
 0x1a5   : > { %v1565_v8 = vadd.f32 %v4688_v39, %v1511_v10  ;;  %v1564_v55 = vadd.f32 %v4688_v39, %v1510_v44  ;;  %v3711_v33 = vunpack.i.h.bf16 %v3709_v59  ;;  %v3710_v53 = vunpack.i.l.bf16 %v3709_v59 }
 0x1a6   : > { %v1710_v36 = vsel %vm1614_vm10, %v1566_v63, %v1662_v51  ;;  %v1711_v21 = vsel %vm1615_vm11, %v1567_v38, %v1663_v3  ;;  %v3813_v3 = vld [vmem:[%s4013_s11 + $0x30] sm:$0xff]  }
 0x1a7   : > { %vm1612_vm12 = vcmp.gt.f32.partialorder %v1564_v55, 0.0  ;;  %vm1613_vm13 = vcmp.gt.f32.partialorder %v1565_v8, 0.0  ;;  %v1737_v9 = vpack.c.bf16 %v1711_v21, %v1710_v36  ;;  %v1660_v34 = vmul.f32 0.2, %v1564_v55 }
 0x1a8   : > { %v3715_v61 = vpop.permute.xlu1 %3714  ;;  %v1661_v52 = vmul.f32 0.2, %v1565_v8  ;;  %v639_v41 = vmul.f32 %v3711_v33, %v4240_v11  ;;  %v638_v5 = vmul.f32 %v3710_v53, %v4240_v11 }
 0x1a9   : > { %1926 = vrot.lane.b32.xlu1 %v1737_v9, %s3915_s16  ;;  %v1708_v48 = vsel %vm1612_vm12, %v1564_v55, %v1660_v34  ;;  %v3717_v20 = vunpack.i.h.bf16 %v3715_v61  ;;  %v3716_v15 = vunpack.i.l.bf16 %v3715_v61  ;;  %v1897_v61 = vpop.permute.xlu0 %1896 }
 0x1aa   : > { %v1709_v32 = vsel %vm1613_vm13, %v1565_v8, %v1661_v52 }
 0x1ab   : > { %v1736_v57 = vpack.c.bf16 %v1709_v32, %v1708_v48  ;;  %v883_v7 = vmul.f32 %v3717_v20, %v4236_v6  ;;  %v882_v31 = vmul.f32 %v3716_v15, %v4236_v6  ;;  %v3812_v6 = vld [vmem:[%s4013_s11 + $0x28] sm:$0xff]   ;;  %v3814_v15 = vld [vmem:[%s4013_s11 + $0x38] sm:$0xff]  }
 0x1ad   : > { %1924 = vrot.lane.b32.xlu0 %v1736_v57, %s3915_s16  ;;  %v3721_v1 = vpop.permute.xlu1 %3720  ;;  %v930_v28 = vadd.f32 %v882_v31, %v638_v5  ;;  %v931_v27 = vadd.f32 %v883_v7, %v639_v41  ;;  %v1901_v53 = vpop.permute.xlu0 %1900  ;;  %v3816_v7 = vld [vmem:[%s4013_s11 + $0x48] sm:$0xff]   ;;  %v3817_v31 = vld [vmem:[%s4013_s11 + $0x50] sm:$0xff]   ;;  %v3818_v41 = vld [vmem:[%s4013_s11 + $0x58] sm:$0xff]  }
 0x1ae   : > { %v3723_v2 = vunpack.i.h.bf16 %v3721_v1  ;;  %v3722_v37 = vunpack.i.l.bf16 %v3721_v1  ;;  %v1953_v1 = vsel %vm1932_vm6, %v3813_v3, %v1897_v61  ;;  %v3819_v5 = vld [vmem:[%s4013_s11 + $0x60] sm:$0xff]  }
 0x1b0   : > { %v641_v30 = vmul.f32 %v3723_v2, %v4240_v11  ;;  %v640_v17 = vmul.f32 %v3722_v37, %v4240_v11  ;;  %v3815_v37 = vld [vmem:[%s4013_s11 + $0x40] sm:$0xff]  }
 0x1b1   : > { %v1891_v35 = vpop.permute.xlu1 %1890  ;;  %v1905_v45 = vpop.permute.xlu0 %1904 }
 0x1b2   : > { %v1944_v25 = vsel %vm1932_vm6, %v3810_v43, %v1891_v35  ;;  %v933_v11 = vadd.f32 %v885_v46, %v641_v30  ;;  %v932_v50 = vadd.f32 %v884_v42, %v640_v17  ;;  %v1965_v17 = vsel %vm1932_vm6, %v3817_v31, %v1905_v45 }
 0x1b3   : > { %3066 = vmatmul.mubr.msk.bf16.gmra.mrb[4].mxu0 %vm2032_vm7, %v1944_v25 }
 0x1b4   : > { %3069 = vmatprep.mubr.msk.bf16.mxu0 %vm2032_vm7, %v1947_v62  ;;  %v1224_v36 = vadd.f32 %v1176_v54, %v932_v50  ;;  %v1225_v21 = vadd.f32 %v1177_v12, %v933_v11  ;;  %v3822_v54 = vld [vmem:[%s4013_s11 + $0x78] sm:$0xff]   ;;  %v3823_v50 = vld [vmem:[%s4013_s11 + $0x80] sm:$0xff]  }
 0x1b5   : > { %v3732_v26 = vpop.permute.xlu1 %3731 }
 0x1b6   : > { %v3734_v56 = vunpack.i.h.bf16 %v3732_v26  ;;  %v3733_v0 = vunpack.i.l.bf16 %v3732_v26 }
 0x1b8   : > { %v1175_v4 = vmul.f32 %v3734_v56, %v4246_v13  ;;  %v1174_v29 = vmul.f32 %v3733_v0, %v4246_v13  ;;  %v1959_v0 = vsel %vm1932_vm6, %v3815_v37, %v1901_v53 }
 0x1ba   : > { %v3744_v14 = vpop.permute.xlu1 %3743  ;;  %v1222_v63 = vadd.f32 %v1174_v29, %v930_v28  ;;  %v1223_v38 = vadd.f32 %v1175_v4, %v931_v27  ;;  %v3821_v27 = vld [vmem:[%s4013_s11 + $0x70] sm:$0xff]  }
 0x1bb   : > { %v3746_v23 = vunpack.i.h.bf16 %v3744_v14  ;;  %v3745_v22 = vunpack.i.l.bf16 %v3744_v14  ;;  %v3820_v14 = vld [vmem:[%s4013_s11 + $0x68] sm:$0xff]  }
 0x1bd   : > { %v1467_v10 = vmul.f32 %v3746_v23, %v4248_v58  ;;  %v1466_v44 = vmul.f32 %v3745_v22, %v4248_v58 }
 0x1be   : > { %v3749_v59 = vpop.permute.xlu1 %3748 }
 0x1bf   : > { %v1514_v24 = vadd.f32 %v1466_v44, %v1222_v63  ;;  %v1515_v8 = vadd.f32 %v1467_v10, %v1223_v38  ;;  %v3751_v55 = vunpack.i.h.bf16 %v3749_v59  ;;  %v3750_v51 = vunpack.i.l.bf16 %v3749_v59  ;;  %v3824_v44 = vld [vmem:[%s4013_s11 + $0x88] sm:$0xff]  }
 0x1c1   : > { %v1568_v13 = vadd.f32 %v4688_v39, %v1514_v24  ;;  %v1569_v9 = vadd.f32 %v4688_v39, %v1515_v8  ;;  %v1469_v34 = vmul.f32 %v3751_v55, %v4248_v58  ;;  %v1468_v52 = vmul.f32 %v3750_v51, %v4248_v58  ;;  %v3781_v24 = vld [vmem:[%s5124_s4 + $0x8] sm:$0xff]   ;;  %v3825_v55 = vld [vmem:[%s4013_s11 + $0x90] sm:$0xff]  }
 0x1c2   : > { %v1895_v19 = vpop.permute.xlu1 %1894 }
 0x1c3   : > { %v1516_v48 = vadd.f32 %v1468_v52, %v1224_v36  ;;  %v1517_v32 = vadd.f32 %v1469_v34, %v1225_v21  ;;  %v1950_v57 = vsel %vm1932_vm6, %v3812_v6, %v1895_v19  ;;  %vm1616_vm14 = vcmp.gt.f32.partialorder %v1568_v13, 0.0  ;;  %v1909_v29 = vpop.permute.xlu0 %1908  ;;  %v3780_v6 = vld [vmem:[%s5124_s4] sm:$0xff]   ;;  %v3826_v36 = vld [vmem:[%s4013_s11 + $0x98] sm:$0xff]  }
 0x1c4   : > { %3070 = vmatmul.mubr.msk.bf16.gmra.mrb[8].mxu0 %vm2032_vm7, %v1950_v57  ;;  %vm1617_vm15 = vcmp.gt.f32.partialorder %v1569_v9, 0.0  ;;  %v1664_v43 = vmul.f32 0.2, %v1568_v13  ;;  %v1665_v16 = vmul.f32 0.2, %v1569_v9  ;;  %v1971_v42 = vsel %vm1932_vm6, %v3819_v5, %v1909_v29  ;;  %3109 = vmatprep.subr.bf16.mxu1 %v3780_v6 }
 0x1c5   : > { %v1570_v40 = vadd.f32 %v4688_v39, %v1516_v48  ;;  %v1571_v35 = vadd.f32 %v4688_v39, %v1517_v32  ;;  %3073 = vmatprep.mubr.msk.bf16.mxu0 %vm2032_vm7, %v1953_v1  ;;  %3110 = vmatpush3.bf16.msra.mxu1 %v3780_v6  ;;  %v3829_v32 = vld [vmem:[%s4013_s11 + $0xb0] sm:$0xff]   ;;  %v3830_v1 = vld [vmem:[%s4013_s11 + $0xb8] sm:$0xff]  }
 0x1c6   : > { %v1712_v58 = vsel %vm1616_vm14, %v1568_v13, %v1664_v43  ;;  %v1713_v25 = vsel %vm1617_vm15, %v1569_v9, %v1665_v16  ;;  %v1899_v33 = vpop.permute.xlu1 %1898  ;;  %3111 = vmatprep.subr.bf16.mxu1 %v3781_v24  ;;  %v3827_v13 = vld [vmem:[%s4013_s11 + $0xa0] sm:$0xff]   ;;  %v3828_v9 = vld [vmem:[%s4013_s11 + $0xa8] sm:$0xff]   ;;  %s239_s11 = sand.u32 1, %s3893_s19  }
 0x1c7   : > { %v1666_v62 = vmul.f32 0.2, %v1570_v40  ;;  %v1667_v20 = vmul.f32 0.2, %v1571_v35  ;;  %v1738_v2 = vpack.c.bf16 %v1713_v25, %v1712_v58  ;;  %vm1618_vm0 = vcmp.gt.f32.partialorder %v1570_v40, 0.0  ;;  %s2916_s17 = sshll.u32 %s239_s11, 6 }
 0x1c8   : > { %vm1619_vm1 = vcmp.gt.f32.partialorder %v1571_v35, 0.0  ;;  %v1956_v56 = vsel %vm1932_vm6, %v3814_v15, %v1899_v33  ;;  %s241_s24 = scalar_lea.vmem [#allocation2], %s2916_s17  ;;  %s5074_s9 = scalar_lea.sflag [#allocation3], %s239_s11 }
 0x1c9   : > { %1928 = vrot.lane.b32.xlu0 %v1738_v2, %s3915_s16  ;;  %v1714_v26 = vsel %vm1618_vm0, %v1570_v40, %v1666_v62  ;;  %v1715_v49 = vsel %vm1619_vm1, %v1571_v35, %v1667_v20  ;;  %3112 = vmatpush3.bf16.msra.mxu1 %v3781_v24  ;;  %s2830_s25 = sshll.u32 %s241_s24, 4  ;;  %s5067_s25 = int_to_ptr.vmem [resolvable:$true] %s2830_s25 }
 0x1ca   : > { %v1739_v47 = vpack.c.bf16 %v1715_v49, %v1714_v26  ;;  %v1903_v60 = vpop.permute.xlu1 %1902  ;;  %p3838_p1 = scmp.lt.s32.totalorder %s5067_s25, %s3836_s12 }
 0x1cb   : > { %v1962_v30 = vsel %vm1932_vm6, %v3816_v7, %v1903_v60 }
 0x1cc   : > { %3074 = vmatmul.mubr.msk.bf16.gmra.mrb[12].mxu0 %vm2032_vm7, %v1956_v56  ;;  %1930 = vrot.lane.b32.xlu1 %v1739_v47, %s3915_s16  ;;  %s3917_s16 = smov 64  }
 0x1cd   : > { %3077 = vmatprep.mubr.msk.bf16.mxu0 %vm2032_vm7, %v1959_v0  ;;  %2029 = vrot.lane.b32.xlu0 %v4688_v39, %s3916_s10  ;;  %s3831_s10 = scalar_lea.vmem %s5067_s25, 1024 }
 0x1ce   : > { %v1907_v4 = vpop.permute.xlu1 %1906  ;;  %p3832_p12 = scmp.ne.s32.totalorder %s5067_s25, %s3831_s10  ;;  %p3839_p2 = scmp.lt.s32.totalorder %s3837_s13, %s3831_s10 }
 0x1cf   : > { %v1968_v46 = vsel %vm1932_vm6, %v3818_v41, %v1907_v4 }
 0x1d0   : > { %2394 = vrot.lane.b32.xlu1 %v4688_v39, %s3917_s16  ;;  %p3833_p13 = pnand %p3832_p12, %p3991_p4  ;;  %p3840_p3 = por %p3839_p2, %p3838_p1 }
 0x1d2   : > { %v1911_v28 = vpop.permute.xlu1 %1910  ;;  %p3834_p0 = pneg %p3833_p13 }
 0x1d3   : > { %v1974_v22 = vsel %vm1932_vm6, %v3820_v14, %v1911_v28 }
 0x1d4   : > { %3078 = vmatmul.mubr.msk.bf16.gmra.mrb[16].mxu0 %vm2032_vm7, %v1962_v30  ;;  %p3841_p5 = pnand %p3840_p3, %p3834_p0 }
 0x1d5   : > { %3081 = vmatprep.mubr.msk.bf16.mxu0 %vm2032_vm7, %v1965_v17 }
 0x1d6   : > { %v1913_v23 = vpop.permute.xlu0 %1912 }
 0x1d7   : > { %v1977_v12 = vsel %vm1932_vm6, %v3821_v27, %v1913_v23 }
 0x1d9   : > { %v1915_v11 = vpop.permute.xlu1 %1914 }
 0x1da   : > { %v1980_v38 = vsel %vm1932_vm6, %v3822_v54, %v1915_v11 }
 0x1dc   : > { %3082 = vmatmul.mubr.msk.bf16.gmra.mrb[20].mxu0 %vm2032_vm7, %v1968_v46 }
 0x1dd   : > { %3085 = vmatprep.mubr.msk.bf16.mxu0 %vm2032_vm7, %v1971_v42 }
 0x1e4   : > { %3086 = vmatmul.mubr.msk.bf16.gmra.mrb[24].mxu0 %vm2032_vm7, %v1974_v22 }
 0x1e5   : > { %3089 = vmatprep.mubr.msk.bf16.mxu0 %vm2032_vm7, %v1977_v12 }
 0x1e9   : > { %v1917_v63 = vpop.permute.xlu0 %1916 }
 0x1ea   : > { %v1983_v10 = vsel %vm1932_vm6, %v3823_v50, %v1917_v63 }
 0x1ec   : > { %3090 = vmatmul.mubr.msk.bf16.gmra.mrb[28].mxu0 %vm2032_vm7, %v1980_v38  ;;  %v1919_v59 = vpop.permute.xlu1 %1918 }
 0x1ed   : > { %3093 = vmatprep.mubr.msk.bf16.mxu0 %vm2032_vm7, %v1983_v10  ;;  %v1986_v8 = vsel %vm1932_vm6, %v3824_v44, %v1919_v59 }
 0x1f4   : > { %3094 = vmatmul.mubr.msk.bf16.gmra.mrb[32].mxu0 %vm2032_vm7, %v1986_v8 }
 0x1fd   : > { %v1921_v51 = vpop.permute.xlu0 %1920 }
 0x1fe   : > { %v1989_v3 = vsel %vm1932_vm6, %v3825_v55, %v1921_v51 }
 0x1ff   : > { %3097 = vmatprep.mubr.msk.bf16.mxu0 %vm2032_vm7, %v1989_v3 }
 0x204   : > { %v1923_v21 = vpop.permute.xlu1 %1922 }
 0x205   : > { %v1992_v61 = vsel %vm1932_vm6, %v3826_v36, %v1923_v21 }
 0x206   : > { %3098 = vmatmul.mubr.msk.bf16.gmra.mrb[36].mxu0 %vm2032_vm7, %v1992_v61 }
 0x21b   : > { %v1927_v34 = vpop.permute.xlu1 %1926 }
 0x21c   : > { %v1998_v48 = vsel %vm1932_vm6, %v3828_v9, %v1927_v34 }
 0x21f   : > { %v1925_v52 = vpop.permute.xlu0 %1924 }
 0x220   : > { %v1995_v19 = vsel %vm1932_vm6, %v3827_v13, %v1925_v52 }
 0x221   : > { %3101 = vmatprep.mubr.msk.bf16.mxu0 %vm2032_vm7, %v1995_v19 }
 0x222   : > { %3102 = vmatmul.mubr.msk.bf16.gmra.mrb[40].mxu0 %vm2032_vm7, %v1998_v48 }
 0x23b   : > { %v1929_v57 = vpop.permute.xlu0 %1928 }
 0x23c   : > { %v2001_v43 = vsel %vm1932_vm6, %v3829_v32, %v1929_v57 }
 0x23d   : > { %3105 = vmatprep.mubr.msk.bf16.mxu0 %vm2032_vm7, %v2001_v43 }
 0x23e   : > { %v1931_v16 = vpop.permute.xlu1 %1930 }
 0x23f   : > { %v2004_v40 = vsel %vm1932_vm6, %v3830_v1, %v1931_v16  ;;  %v4880_v35 = vpop.permute.xlu0 %2029 }
 0x240   : > { %3106 = vmatmul.mubr.msk.bf16.gmra.mrb[44].mxu0 %vm2032_vm7, %v2004_v40 }
 0x26a   : > { %v3063_v58 = vpop.f32.mrb[0].mxu0 }
 0x26b   : > { %v2115_v25 = vpop.f32.mrb[1].mxu0  ;;  %v2124_v62 = vadd.f32 %v3063_v58, %v4880_v35 }
 0x26c   : > { %v2116_v20 = vadd.f32 %v2115_v25, %v4880_v35  ;;  %v3064_v15 = vpop.f32.mrb[2].mxu0 }
 0x26d   : > { %v2127_v2 = vadd.f32 %v3064_v15, %v4880_v35  ;;  %v2118_v37 = vpop.f32.mrb[3].mxu0  ;;  %v2308_v53 = vmax.f32 %v2124_v62, 0.0 }
 0x26e   : > { %v2119_v33 = vadd.f32 %v2118_v37, %v4880_v35  ;;  %v2306_v49 = vmax.f32 %v2116_v20, 0.0 }
 0x26f   : > { %v2309_v26 = vmax.f32 %v2127_v2, 0.0 }
 0x270   : > { %v2307_v47 = vmax.f32 %v2119_v33, 0.0 }
 0x271   : > { %v2355_v56 = vpack.c.bf16 %v2309_v26, %v2308_v53 }
 0x272   : > { %v2354_v39 = vpack.c.bf16 %v2307_v47, %v2306_v49 }
 0x274   : > { %3113 = vmatprep.mubr.msk.bf16.mxu1 %vm2397_vm2, %v2354_v39 }
 0x275   : > { %3114 = vmatmul.mubr.msk.bf16.vlgmr.msra.gmra.mrb[0].mxu1 %vm2397_vm2, %v2355_v56 }
 0x286   : > { %v3067_v0 = vpop.f32.mrb[4].mxu0 }
 0x287   : > { %v2140_v7 = vadd.f32 %v3067_v0, %v4880_v35  ;;  %v2131_v31 = vpop.f32.mrb[5].mxu0 }
 0x288   : > { %v2132_v60 = vadd.f32 %v2131_v31, %v4880_v35  ;;  %v3068_v45 = vpop.f32.mrb[6].mxu0 }
 0x289   : > { %v2143_v30 = vadd.f32 %v3068_v45, %v4880_v35  ;;  %v2134_v17 = vpop.f32.mrb[7].mxu0  ;;  %v2312_v5 = vmax.f32 %v2140_v7, 0.0 }
 0x28a   : > { %v2135_v41 = vadd.f32 %v2134_v17, %v4880_v35  ;;  %v2310_v29 = vmax.f32 %v2132_v60, 0.0 }
 0x28b   : > { %v2313_v4 = vmax.f32 %v2143_v30, 0.0 }
 0x28c   : > { %v2311_v46 = vmax.f32 %v2135_v41, 0.0 }
 0x28d   : > { %v2357_v42 = vpack.c.bf16 %v2313_v4, %v2312_v5 }
 0x28e   : > { %v2356_v14 = vpack.c.bf16 %v2311_v46, %v2310_v29 }
 0x290   : > { %3117 = vmatprep.mubr.msk.bf16.mxu1 %vm2397_vm2, %v2356_v14 }
 0x291   : > { %3118 = vmatmul.mubr.msk.bf16.gmra.mrb[4].mxu1 %vm2397_vm2, %v2357_v42 }
 0x297   : > { %v3071_v28 = vpop.f32.mrb[8].mxu0 }
 0x298   : > { %v2156_v27 = vadd.f32 %v3071_v28, %v4880_v35  ;;  %v2147_v23 = vpop.f32.mrb[9].mxu0 }
 0x299   : > { %v2148_v22 = vadd.f32 %v2147_v23, %v4880_v35  ;;  %v3072_v12 = vpop.f32.mrb[10].mxu0 }
 0x29a   : > { %v2159_v54 = vadd.f32 %v3072_v12, %v4880_v35  ;;  %v2150_v11 = vpop.f32.mrb[11].mxu0  ;;  %v2316_v63 = vmax.f32 %v2156_v27, 0.0 }
 0x29b   : > { %v2151_v50 = vadd.f32 %v2150_v11, %v4880_v35  ;;  %v2314_v10 = vmax.f32 %v2148_v22, 0.0 }
 0x29c   : > { %v2317_v38 = vmax.f32 %v2159_v54, 0.0 }
 0x29d   : > { %v2315_v44 = vmax.f32 %v2151_v50, 0.0 }
 0x29e   : > { %v2359_v59 = vpack.c.bf16 %v2317_v38, %v2316_v63 }
 0x29f   : > { %v2358_v6 = vpack.c.bf16 %v2315_v44, %v2314_v10  ;;  %v3075_v24 = vpop.f32.mrb[12].mxu0 }
 0x2a0   : > { %v2172_v8 = vadd.f32 %v3075_v24, %v4880_v35  ;;  %v2163_v55 = vpop.f32.mrb[13].mxu0 }
 0x2a1   : > { %v2164_v51 = vadd.f32 %v2163_v55, %v4880_v35  ;;  %v3076_v3 = vpop.f32.mrb[14].mxu0  ;;  %3121 = vmatprep.mubr.msk.bf16.mxu1 %vm2397_vm2, %v2358_v6 }
 0x2a2   : > { %v2175_v36 = vadd.f32 %v3076_v3, %v4880_v35  ;;  %v2166_v21 = vpop.f32.mrb[15].mxu0  ;;  %3122 = vmatmul.mubr.msk.bf16.gmra.mrb[8].mxu1 %vm2397_vm2, %v2359_v59  ;;  %v2320_v13 = vmax.f32 %v2172_v8, 0.0 }
 0x2a3   : > { %v2167_v61 = vadd.f32 %v2166_v21, %v4880_v35  ;;  %v2318_v34 = vmax.f32 %v2164_v51, 0.0 }
 0x2a4   : > { %v2321_v9 = vmax.f32 %v2175_v36, 0.0 }
 0x2a5   : > { %v2319_v52 = vmax.f32 %v2167_v61, 0.0 }
 0x2a6   : > { %v2361_v19 = vpack.c.bf16 %v2321_v9, %v2320_v13 }
 0x2a7   : > { %v2360_v48 = vpack.c.bf16 %v2319_v52, %v2318_v34  ;;  %v3079_v32 = vpop.f32.mrb[16].mxu0 }
 0x2a8   : > { %v2188_v57 = vadd.f32 %v3079_v32, %v4880_v35  ;;  %v2179_v1 = vpop.f32.mrb[17].mxu0 }
 0x2a9   : > { %v2180_v43 = vadd.f32 %v2179_v1, %v4880_v35  ;;  %v3080_v16 = vpop.f32.mrb[18].mxu0  ;;  %3125 = vmatprep.mubr.msk.bf16.mxu1 %vm2397_vm2, %v2360_v48 }
 0x2aa   : > { %v2191_v40 = vadd.f32 %v3080_v16, %v4880_v35  ;;  %v2182_v58 = vpop.f32.mrb[19].mxu0  ;;  %3126 = vmatmul.mubr.msk.bf16.gmra.mrb[12].mxu1 %vm2397_vm2, %v2361_v19  ;;  %v2324_v62 = vmax.f32 %v2188_v57, 0.0 }
 0x2ab   : > { %v2183_v25 = vadd.f32 %v2182_v58, %v4880_v35  ;;  %v2322_v15 = vmax.f32 %v2180_v43, 0.0 }
 0x2ac   : > { %v2325_v20 = vmax.f32 %v2191_v40, 0.0 }
 0x2ad   : > { %v2323_v2 = vmax.f32 %v2183_v25, 0.0 }
 0x2ae   : > { %v2363_v37 = vpack.c.bf16 %v2325_v20, %v2324_v62 }
 0x2af   : > { %v2362_v33 = vpack.c.bf16 %v2323_v2, %v2322_v15  ;;  %v3083_v53 = vpop.f32.mrb[20].mxu0 }
 0x2b0   : > { %v2204_v26 = vadd.f32 %v3083_v53, %v4880_v35  ;;  %v2195_v49 = vpop.f32.mrb[21].mxu0 }
 0x2b1   : > { %v2196_v47 = vadd.f32 %v2195_v49, %v4880_v35  ;;  %v3084_v56 = vpop.f32.mrb[22].mxu0  ;;  %3129 = vmatprep.mubr.msk.bf16.mxu1 %vm2397_vm2, %v2362_v33 }
 0x2b2   : > { %v2207_v39 = vadd.f32 %v3084_v56, %v4880_v35  ;;  %v2198_v0 = vpop.f32.mrb[23].mxu0  ;;  %3130 = vmatmul.mubr.msk.bf16.gmra.mrb[16].mxu1 %vm2397_vm2, %v2363_v37  ;;  %v2328_v31 = vmax.f32 %v2204_v26, 0.0 }
 0x2b3   : > { %v2199_v7 = vadd.f32 %v2198_v0, %v4880_v35  ;;  %v2326_v45 = vmax.f32 %v2196_v47, 0.0 }
 0x2b4   : > { %v2329_v60 = vmax.f32 %v2207_v39, 0.0 }
 0x2b5   : > { %v2327_v30 = vmax.f32 %v2199_v7, 0.0 }
 0x2b6   : > { %v2365_v17 = vpack.c.bf16 %v2329_v60, %v2328_v31 }
 0x2b7   : > { %v2364_v41 = vpack.c.bf16 %v2327_v30, %v2326_v45  ;;  %v3087_v5 = vpop.f32.mrb[24].mxu0 }
 0x2b8   : > { %v2220_v4 = vadd.f32 %v3087_v5, %v4880_v35  ;;  %v2211_v29 = vpop.f32.mrb[25].mxu0 }
 0x2b9   : > { %v2212_v46 = vadd.f32 %v2211_v29, %v4880_v35  ;;  %v3088_v42 = vpop.f32.mrb[26].mxu0  ;;  %3133 = vmatprep.mubr.msk.bf16.mxu1 %vm2397_vm2, %v2364_v41 }
 0x2ba   : > { %v2223_v14 = vadd.f32 %v3088_v42, %v4880_v35  ;;  %v2214_v28 = vpop.f32.mrb[27].mxu0  ;;  %3134 = vmatmul.mubr.msk.bf16.gmra.mrb[20].mxu1 %vm2397_vm2, %v2365_v17  ;;  %v2332_v23 = vmax.f32 %v2220_v4, 0.0 }
 0x2bb   : > { %v2215_v27 = vadd.f32 %v2214_v28, %v4880_v35  ;;  %v2330_v12 = vmax.f32 %v2212_v46, 0.0 }
 0x2bc   : > { %v2333_v22 = vmax.f32 %v2223_v14, 0.0 }
 0x2bd   : > { %v2331_v54 = vmax.f32 %v2215_v27, 0.0 }
 0x2be   : > { %v2367_v11 = vpack.c.bf16 %v2333_v22, %v2332_v23 }
 0x2bf   : > { %v2366_v50 = vpack.c.bf16 %v2331_v54, %v2330_v12  ;;  %v3091_v63 = vpop.f32.mrb[28].mxu0 }
 0x2c0   : > { %v2236_v38 = vadd.f32 %v3091_v63, %v4880_v35  ;;  %v2227_v10 = vpop.f32.mrb[29].mxu0 }
 0x2c1   : > { %v2228_v44 = vadd.f32 %v2227_v10, %v4880_v35  ;;  %v3092_v59 = vpop.f32.mrb[30].mxu0  ;;  %3137 = vmatprep.mubr.msk.bf16.mxu1 %vm2397_vm2, %v2366_v50 }
 0x2c2   : > { %v2239_v6 = vadd.f32 %v3092_v59, %v4880_v35  ;;  %v2230_v24 = vpop.f32.mrb[31].mxu0  ;;  %3138 = vmatmul.mubr.msk.bf16.gmra.mrb[24].mxu1 %vm2397_vm2, %v2367_v11  ;;  %v2336_v55 = vmax.f32 %v2236_v38, 0.0 }
 0x2c3   : > { %v2231_v8 = vadd.f32 %v2230_v24, %v4880_v35  ;;  %v2334_v3 = vmax.f32 %v2228_v44, 0.0 }
 0x2c4   : > { %v2337_v51 = vmax.f32 %v2239_v6, 0.0 }
 0x2c5   : > { %v2335_v36 = vmax.f32 %v2231_v8, 0.0 }
 0x2c6   : > { %v2369_v21 = vpack.c.bf16 %v2337_v51, %v2336_v55 }
 0x2c7   : > { %v2368_v61 = vpack.c.bf16 %v2335_v36, %v2334_v3  ;;  %v3095_v13 = vpop.f32.mrb[32].mxu0 }
 0x2c8   : > { %v2252_v9 = vadd.f32 %v3095_v13, %v4880_v35  ;;  %v2243_v34 = vpop.f32.mrb[33].mxu0 }
 0x2c9   : > { %v2244_v52 = vadd.f32 %v2243_v34, %v4880_v35  ;;  %v3096_v19 = vpop.f32.mrb[34].mxu0  ;;  %3141 = vmatprep.mubr.msk.bf16.mxu1 %vm2397_vm2, %v2368_v61 }
 0x2ca   : > { %v2255_v48 = vadd.f32 %v3096_v19, %v4880_v35  ;;  %v2246_v32 = vpop.f32.mrb[35].mxu0  ;;  %3142 = vmatmul.mubr.msk.bf16.gmra.mrb[28].mxu1 %vm2397_vm2, %v2369_v21  ;;  %v2340_v1 = vmax.f32 %v2252_v9, 0.0 }
 0x2cb   : > { %v2247_v57 = vadd.f32 %v2246_v32, %v4880_v35  ;;  %v2338_v16 = vmax.f32 %v2244_v52, 0.0 }
 0x2cc   : > { %v2341_v43 = vmax.f32 %v2255_v48, 0.0 }
 0x2cd   : > { %v2339_v40 = vmax.f32 %v2247_v57, 0.0 }
 0x2ce   : > { %v2371_v58 = vpack.c.bf16 %v2341_v43, %v2340_v1  ;;  %v4962_v43 = vpop.permute.xlu1 %2394 }
 0x2cf   : > { %v2370_v25 = vpack.c.bf16 %v2339_v40, %v2338_v16 }
 0x2d1   : > { %3145 = vmatprep.mubr.msk.bf16.mxu1 %vm2397_vm2, %v2370_v25 }
 0x2d2   : > { %3146 = vmatmul.mubr.msk.bf16.gmra.mrb[32].mxu1 %vm2397_vm2, %v2371_v58 }
 0x2d9   : > { %v3099_v62 = vpop.f32.mrb[36].mxu0 }
 0x2da   : > { %v2268_v20 = vadd.f32 %v3099_v62, %v4880_v35  ;;  %v2259_v15 = vpop.f32.mrb[37].mxu0 }
 0x2db   : > { %v2260_v2 = vadd.f32 %v2259_v15, %v4880_v35  ;;  %v3100_v37 = vpop.f32.mrb[38].mxu0 }
 0x2dc   : > { %v2271_v33 = vadd.f32 %v3100_v37, %v4880_v35  ;;  %v2262_v53 = vpop.f32.mrb[39].mxu0  ;;  %v2344_v49 = vmax.f32 %v2268_v20, 0.0 }
 0x2dd   : > { %v2263_v26 = vadd.f32 %v2262_v53, %v4880_v35  ;;  %v2342_v56 = vmax.f32 %v2260_v2, 0.0 }
 0x2de   : > { %v2345_v47 = vmax.f32 %v2271_v33, 0.0 }
 0x2df   : > { %v2343_v39 = vmax.f32 %v2263_v26, 0.0 }
 0x2e0   : > { %v2373_v0 = vpack.c.bf16 %v2345_v47, %v2344_v49 }
 0x2e1   : > { %v2372_v7 = vpack.c.bf16 %v2343_v39, %v2342_v56 }
 0x2e3   : > { %3149 = vmatprep.mubr.msk.bf16.mxu1 %vm2397_vm2, %v2372_v7 }
 0x2e4   : > { %3150 = vmatmul.mubr.msk.bf16.gmra.mrb[36].mxu1 %vm2397_vm2, %v2373_v0 }
 0x2f5   : > { %v3103_v31 = vpop.f32.mrb[40].mxu0 }
 0x2f6   : > { %v2284_v60 = vadd.f32 %v3103_v31, %v4880_v35  ;;  %v2275_v45 = vpop.f32.mrb[41].mxu0 }
 0x2f7   : > { %v2276_v30 = vadd.f32 %v2275_v45, %v4880_v35  ;;  %v3104_v17 = vpop.f32.mrb[42].mxu0 }
 0x2f8   : > { %v2287_v41 = vadd.f32 %v3104_v17, %v4880_v35  ;;  %v2278_v5 = vpop.f32.mrb[43].mxu0  ;;  %v2348_v29 = vmax.f32 %v2284_v60, 0.0 }
 0x2f9   : > { %v2279_v4 = vadd.f32 %v2278_v5, %v4880_v35  ;;  %v2346_v42 = vmax.f32 %v2276_v30, 0.0 }
 0x2fa   : > { %v2349_v46 = vmax.f32 %v2287_v41, 0.0 }
 0x2fb   : > { %v2347_v14 = vmax.f32 %v2279_v4, 0.0 }
 0x2fc   : > { %v2375_v28 = vpack.c.bf16 %v2349_v46, %v2348_v29 }
 0x2fd   : > { %v2374_v27 = vpack.c.bf16 %v2347_v14, %v2346_v42 }
 0x2ff   : > { %3153 = vmatprep.mubr.msk.bf16.mxu1 %vm2397_vm2, %v2374_v27 }
 0x300   : > { %3154 = vmatmul.mubr.msk.bf16.gmra.mrb[40].mxu1 %vm2397_vm2, %v2375_v28 }
 0x313   : > { %v3107_v23 = vpop.f32.mrb[44].mxu0 }
 0x314   : > { %v2300_v22 = vadd.f32 %v3107_v23, %v4880_v35  ;;  %v2291_v12 = vpop.f32.mrb[45].mxu0 }
 0x315   : > { %v2292_v54 = vadd.f32 %v2291_v12, %v4880_v35  ;;  %v3108_v11 = vpop.f32.mrb[46].mxu0 }
 0x316   : > { %v2303_v50 = vadd.f32 %v3108_v11, %v4880_v35  ;;  %v2294_v63 = vpop.f32.mrb[47].mxu0  ;;  %v2352_v10 = vmax.f32 %v2300_v22, 0.0 }
 0x317   : > { %v2295_v38 = vadd.f32 %v2294_v63, %v4880_v35  ;;  %v2350_v59 = vmax.f32 %v2292_v54, 0.0 }
 0x318   : > { %v2353_v44 = vmax.f32 %v2303_v50, 0.0 }
 0x319   : > { %v2351_v6 = vmax.f32 %v2295_v38, 0.0 }
 0x31a   : > { %v2377_v24 = vpack.c.bf16 %v2353_v44, %v2352_v10 }
 0x31b   : > { %v2376_v8 = vpack.c.bf16 %v2351_v6, %v2350_v59 }
 0x31d   : > { %3157 = vmatprep.mubr.msk.bf16.mxu1 %vm2397_vm2, %v2376_v8 }
 0x31e   : > { %3158 = vmatmul.mubr.msk.bf16.gmra.mrb[44].mxu1 %vm2397_vm2, %v2377_v24 }
 0x348   : > { %v3115_v55 = vpop.f32.mrb[0].mxu1 }
 0x349   : > { %v2504_v51 = vpop.f32.mrb[1].mxu1  ;;  %v2513_v16 = vadd.f32 %v3115_v55, %v4962_v43 }
 0x34a   : > { %v3116_v3 = vpop.f32.mrb[2].mxu1  ;;  %v2505_v40 = vadd.f32 %v2504_v51, %v4962_v43 }
 0x34b   : > { %v2507_v36 = vpop.f32.mrb[3].mxu1  ;;  %v2516_v25 = vadd.f32 %v3116_v3, %v4962_v43  ;;  %v2697_v33 = vmax.f32 %v2513_v16, 0.0 }
 0x34c   : > { %v2508_v15 = vadd.f32 %v2507_v36, %v4962_v43  ;;  %v2695_v47 = vmax.f32 %v2505_v40, 0.0 }
 0x34d   : > { %v2698_v0 = vmax.f32 %v2516_v25, 0.0 }
 0x34e   : > { %v2696_v60 = vmax.f32 %v2508_v15, 0.0 }
 0x364   : > { %v3119_v21 = vpop.f32.mrb[4].mxu1 }
 0x365   : > { %v2520_v61 = vpop.f32.mrb[5].mxu1  ;;  %v2529_v17 = vadd.f32 %v3119_v21, %v4962_v43 }
 0x366   : > { %v3120_v13 = vpop.f32.mrb[6].mxu1  ;;  %v2521_v5 = vadd.f32 %v2520_v61, %v4962_v43 }
 0x367   : > { %v2523_v9 = vpop.f32.mrb[7].mxu1  ;;  %v2532_v46 = vadd.f32 %v3120_v13, %v4962_v43  ;;  %v2701_v22 = vmax.f32 %v2529_v17, 0.0 }
 0x368   : > { %v2524_v28 = vadd.f32 %v2523_v9, %v4962_v43  ;;  %v2699_v50 = vmax.f32 %v2521_v5, 0.0 }
 0x369   : > { %v2702_v10 = vmax.f32 %v2532_v46, 0.0 }
 0x36a   : > { %v2700_v6 = vmax.f32 %v2524_v28, 0.0 }
 0x375   : > { %v3123_v34 = vpop.f32.mrb[8].mxu1 }
 0x376   : > { %v2536_v35 = vpop.f32.mrb[9].mxu1  ;;  %v2545_v55 = vadd.f32 %v3123_v34, %v4962_v43 }
 0x377   : > { %v3124_v52 = vpop.f32.mrb[10].mxu1  ;;  %v2537_v3 = vadd.f32 %v2536_v35, %v4962_v43 }
 0x378   : > { %v2539_v19 = vpop.f32.mrb[11].mxu1  ;;  %v2548_v61 = vadd.f32 %v3124_v52, %v4962_v43  ;;  %v2705_v25 = vmax.f32 %v2545_v55, 0.0 }
 0x379   : > { %v2540_v16 = vadd.f32 %v2539_v19, %v4962_v43  ;;  %v2703_v15 = vmax.f32 %v2537_v3, 0.0 }
 0x37d   : > { %v4954_v48 = vpop.f32.mrb[12].mxu1 }
 0x37e   : > { %v4956_v32 = vpop.f32.mrb[13].mxu1 }
 0x37f   : > { %v4958_v57 = vpop.f32.mrb[14].mxu1 }
 0x380   : > { %v4960_v1 = vpop.f32.mrb[15].mxu1 }
 0x381   : > { %v2556_v17 = vadd.f32 %v4960_v1, %v4962_v43 }
 0x385   : > { %v3131_v58 = vpop.f32.mrb[16].mxu1 }
 0x386   : > { %v2577_v62 = vadd.f32 %v3131_v58, %v4962_v43  ;;  %v2568_v20 = vpop.f32.mrb[17].mxu1 }
 0x387   : > { %v2569_v2 = vadd.f32 %v2568_v20, %v4962_v43  ;;  %v3132_v37 = vpop.f32.mrb[18].mxu1 }
 0x388   : > { %v2713_v53 = vmax.f32 %v2577_v62, 0.0  ;;  %v2580_v26 = vadd.f32 %v3132_v37, %v4962_v43  ;;  %v2571_v49 = vpop.f32.mrb[19].mxu1  ;;  %v2706_v37 = vmax.f32 %v2548_v61, 0.0 }
 0x389   : > { %v2711_v56 = vmax.f32 %v2569_v2, 0.0  ;;  %v2572_v39 = vadd.f32 %v2571_v49, %v4962_v43  ;;  %v2561_v49 = vadd.f32 %v4954_v48, %v4962_v43 }
 0x38a   : > { %v4972_v7 = vadd.f32 %v2713_v53, %v2697_v33  ;;  %v2714_v31 = vmax.f32 %v2580_v26, 0.0  ;;  %v2704_v53 = vmax.f32 %v2540_v16, 0.0 }
 0x38b   : > { %v4974_v45 = vadd.f32 %v2711_v56, %v2695_v47  ;;  %v2712_v30 = vmax.f32 %v2572_v39, 0.0  ;;  %v2553_v56 = vadd.f32 %v4956_v32, %v4962_v43 }
 0x38c   : > { %v4977_v41 = vadd.f32 %v2714_v31, %v2698_v0  ;;  %v2564_v31 = vadd.f32 %v4958_v57, %v4962_v43 }
 0x38d   : > { %v4980_v4 = vadd.f32 %v2712_v30, %v2696_v60  ;;  %v3135_v29 = vpop.f32.mrb[20].mxu1 }
 0x38e   : > { %v2593_v42 = vadd.f32 %v3135_v29, %v4962_v43  ;;  %v2584_v14 = vpop.f32.mrb[21].mxu1  ;;  %v2709_v29 = vmax.f32 %v2561_v49, 0.0 }
 0x38f   : > { %v2585_v27 = vadd.f32 %v2584_v14, %v4962_v43  ;;  %v3136_v23 = vpop.f32.mrb[22].mxu1  ;;  %v2707_v14 = vmax.f32 %v2553_v56, 0.0 }
 0x390   : > { %v2717_v12 = vmax.f32 %v2593_v42, 0.0  ;;  %v2596_v54 = vadd.f32 %v3136_v23, %v4962_v43  ;;  %v2587_v11 = vpop.f32.mrb[23].mxu1  ;;  %v2710_v23 = vmax.f32 %v2564_v31, 0.0 }
 0x391   : > { %v2715_v63 = vmax.f32 %v2585_v27, 0.0  ;;  %v2588_v38 = vadd.f32 %v2587_v11, %v4962_v43 }
 0x392   : > { %v4988_v44 = vadd.f32 %v2717_v12, %v2701_v22  ;;  %v2718_v59 = vmax.f32 %v2596_v54, 0.0  ;;  %v2708_v12 = vmax.f32 %v2556_v17, 0.0 }
 0x393   : > { %v4990_v24 = vadd.f32 %v2715_v63, %v2699_v50  ;;  %v2716_v8 = vmax.f32 %v2588_v38, 0.0 }
 0x394   : > { %v4993_v51 = vadd.f32 %v2718_v59, %v2702_v10 }
 0x395   : > { %v4996_v36 = vadd.f32 %v2716_v8, %v2700_v6  ;;  %v3139_v21 = vpop.f32.mrb[24].mxu1 }
 0x396   : > { %v2609_v13 = vadd.f32 %v3139_v21, %v4962_v43  ;;  %v2600_v9 = vpop.f32.mrb[25].mxu1 }
 0x397   : > { %v2601_v40 = vadd.f32 %v2600_v9, %v4962_v43  ;;  %v3140_v58 = vpop.f32.mrb[26].mxu1 }
 0x398   : > { %v2721_v62 = vmax.f32 %v2609_v13, 0.0  ;;  %v2612_v34 = vadd.f32 %v3140_v58, %v4962_v43  ;;  %v2603_v20 = vpop.f32.mrb[27].mxu1 }
 0x399   : > { %v2719_v35 = vmax.f32 %v2601_v40, 0.0  ;;  %v2604_v2 = vadd.f32 %v2603_v20, %v4962_v43 }
 0x39a   : > { %v5004_v33 = vadd.f32 %v2721_v62, %v2705_v25  ;;  %v2722_v52 = vmax.f32 %v2612_v34, 0.0 }
 0x39b   : > { %v5006_v26 = vadd.f32 %v2719_v35, %v2703_v15  ;;  %v2720_v19 = vmax.f32 %v2604_v2, 0.0 }
 0x39c   : > { %v5010_v47 = vadd.f32 %v2722_v52, %v2706_v37 }
 0x39d   : > { %v5014_v39 = vadd.f32 %v2720_v19, %v2704_v53  ;;  %v3143_v0 = vpop.f32.mrb[28].mxu1 }
 0x39e   : > { %v2625_v60 = vadd.f32 %v3143_v0, %v4962_v43  ;;  %v2616_v30 = vpop.f32.mrb[29].mxu1 }
 0x39f   : > { %v2617_v5 = vadd.f32 %v2616_v30, %v4962_v43  ;;  %v3144_v48 = vpop.f32.mrb[30].mxu1 }
 0x3a0   : > { %v2725_v46 = vmax.f32 %v2625_v60, 0.0  ;;  %v2628_v42 = vadd.f32 %v3144_v48, %v4962_v43  ;;  %v2619_v32 = vpop.f32.mrb[31].mxu1 }
 0x3a1   : > { %v2723_v28 = vmax.f32 %v2617_v5, 0.0  ;;  %v2620_v27 = vadd.f32 %v2619_v32, %v4962_v43 }
 0x3a2   : > { %v5024_v57 = vadd.f32 %v2725_v46, %v2709_v29  ;;  %v2726_v22 = vmax.f32 %v2628_v42, 0.0 }
 0x3a3   : > { %v5026_v54 = vadd.f32 %v2723_v28, %v2707_v14  ;;  %v2724_v1 = vmax.f32 %v2620_v27, 0.0 }
 0x3a4   : > { %v5028_v11 = vadd.f32 %v2726_v22, %v2710_v23 }
 0x3a5   : > { %v5030_v50 = vadd.f32 %v2724_v1, %v2708_v12  ;;  %v3147_v63 = vpop.f32.mrb[32].mxu1 }
 0x3a6   : > { %v2641_v38 = vadd.f32 %v3147_v63, %v4962_v43  ;;  %v2632_v10 = vpop.f32.mrb[33].mxu1 }
 0x3a7   : > { %v2633_v59 = vadd.f32 %v2632_v10, %v4962_v43  ;;  %v3148_v6 = vpop.f32.mrb[34].mxu1 }
 0x3a8   : > { %v2729_v8 = vmax.f32 %v2641_v38, 0.0  ;;  %v2644_v55 = vadd.f32 %v3148_v6, %v4962_v43  ;;  %v2635_v3 = vpop.f32.mrb[35].mxu1 }
 0x3a9   : > { %v2727_v21 = vmax.f32 %v2633_v59, 0.0  ;;  %v2636_v61 = vadd.f32 %v2635_v3, %v4962_v43 }
 0x3aa   : > { %v2761_v13 = vadd.f32 %v4972_v7, %v2729_v8  ;;  %v2730_v9 = vmax.f32 %v2644_v55, 0.0 }
 0x3ab   : > { %v2759_v16 = vadd.f32 %v4974_v45, %v2727_v21  ;;  %v2728_v40 = vmax.f32 %v2636_v61, 0.0 }
 0x3ac   : > { %v2762_v58 = vadd.f32 %v4977_v41, %v2730_v9 }
 0x3ad   : > { %v2760_v25 = vadd.f32 %v4980_v4, %v2728_v40  ;;  %2775 = vxpose.xlu0.b32.start [1/16] (narrow) %v2759_v16, 64 }
 0x3b1   : > { %2776 = vxpose.xlu0.b32.cont [2/16] (narrow) %v2760_v25, 64 }
 0x3b5   : > { %2777 = vxpose.xlu0.b32.cont [3/16] (narrow) %v2761_v13, 64 }
 0x3b7   : > { %v3151_v62 = vpop.f32.mrb[36].mxu1 }
 0x3b8   : > { %v2657_v34 = vadd.f32 %v3151_v62, %v4962_v43  ;;  %v2648_v20 = vpop.f32.mrb[37].mxu1 }
 0x3b9   : > { %v2649_v15 = vadd.f32 %v2648_v20, %v4962_v43  ;;  %v3152_v35 = vpop.f32.mrb[38].mxu1  ;;  %2778 = vxpose.xlu0.b32.cont [4/16] (narrow) %v2762_v58, 64 }
 0x3ba   : > { %v2733_v7 = vmax.f32 %v2657_v34, 0.0  ;;  %v2660_v2 = vadd.f32 %v3152_v35, %v4962_v43  ;;  %v2651_v45 = vpop.f32.mrb[39].mxu1 }
 0x3bb   : > { %v2731_v37 = vmax.f32 %v2649_v15, 0.0  ;;  %v2652_v41 = vadd.f32 %v2651_v45, %v4962_v43 }
 0x3bc   : > { %v2765_v4 = vadd.f32 %v4988_v44, %v2733_v7  ;;  %v2734_v52 = vmax.f32 %v2660_v2, 0.0 }
 0x3bd   : > { %v2763_v53 = vadd.f32 %v4990_v24, %v2731_v37  ;;  %v2732_v19 = vmax.f32 %v2652_v41, 0.0 }
 0x3be   : > { %v2766_v49 = vadd.f32 %v4993_v51, %v2734_v52 }
 0x3bf   : > { %v2764_v56 = vadd.f32 %v4996_v36, %v2732_v19  ;;  %2779 = vxpose.xlu0.b32.cont [5/16] (narrow) %v2763_v53, 64 }
 0x3c3   : > { %2780 = vxpose.xlu0.b32.cont [6/16] (narrow) %v2764_v56, 64 }
 0x3c7   : > { %2781 = vxpose.xlu0.b32.cont [7/16] (narrow) %v2765_v4, 64 }
 0x3cb   : > { %2782 = vxpose.xlu0.b32.cont [8/16] (narrow) %v2766_v49, 64 }
 0x3d3   : > { %v3155_v0 = vpop.f32.mrb[40].mxu1 }
 0x3d4   : > { %v2673_v31 = vadd.f32 %v3155_v0, %v4962_v43  ;;  %v2664_v60 = vpop.f32.mrb[41].mxu1 }
 0x3d5   : > { %v2665_v30 = vadd.f32 %v2664_v60, %v4962_v43  ;;  %v3156_v17 = vpop.f32.mrb[42].mxu1 }
 0x3d6   : > { %v2737_v44 = vmax.f32 %v2673_v31, 0.0  ;;  %v2676_v5 = vadd.f32 %v3156_v17, %v4962_v43  ;;  %v2667_v24 = vpop.f32.mrb[43].mxu1 }
 0x3d7   : > { %v2735_v48 = vmax.f32 %v2665_v30, 0.0  ;;  %v2668_v51 = vadd.f32 %v2667_v24, %v4962_v43 }
 0x3d8   : > { %v2769_v36 = vadd.f32 %v5004_v33, %v2737_v44  ;;  %v2738_v29 = vmax.f32 %v2676_v5, 0.0 }
 0x3d9   : > { %v2767_v46 = vadd.f32 %v5006_v26, %v2735_v48  ;;  %v2736_v42 = vmax.f32 %v2668_v51, 0.0 }
 0x3da   : > { %v2770_v32 = vadd.f32 %v5010_v47, %v2738_v29 }
 0x3db   : > { %v2768_v14 = vadd.f32 %v5014_v39, %v2736_v42  ;;  %2783 = vxpose.xlu0.b32.cont [9/16] (narrow) %v2767_v46, 64 }
 0x3df   : > { %2784 = vxpose.xlu0.b32.cont [10/16] (narrow) %v2768_v14, 64 }
 0x3e3   : > { %2785 = vxpose.xlu0.b32.cont [11/16] (narrow) %v2769_v36, 64 }
 0x3e7   : > { %2786 = vxpose.xlu0.b32.cont [12/16] (narrow) %v2770_v32, 64 }
 0x3f1   : > { %v3159_v28 = vpop.f32.mrb[44].mxu1 }
 0x3f2   : > { %v2689_v27 = vadd.f32 %v3159_v28, %v4962_v43  ;;  %v2680_v23 = vpop.f32.mrb[45].mxu1 }
 0x3f3   : > { %v2681_v22 = vadd.f32 %v2680_v23, %v4962_v43  ;;  %v3160_v12 = vpop.f32.mrb[46].mxu1 }
 0x3f4   : > { %v2741_v33 = vmax.f32 %v2689_v27, 0.0  ;;  %v2692_v26 = vadd.f32 %v3160_v12, %v4962_v43  ;;  %v2683_v1 = vpop.f32.mrb[47].mxu1 }
 0x3f5   : > { %v2739_v63 = vmax.f32 %v2681_v22, 0.0  ;;  %v2684_v47 = vadd.f32 %v2683_v1, %v4962_v43 }
 0x3f6   : > { %v2773_v39 = vadd.f32 %v5024_v57, %v2741_v33  ;;  %v2742_v38 = vmax.f32 %v2692_v26, 0.0 }
 0x3f7   : > { %v2771_v10 = vadd.f32 %v5026_v54, %v2739_v63  ;;  %v2740_v59 = vmax.f32 %v2684_v47, 0.0 }
 0x3f8   : > { %v2774_v6 = vadd.f32 %v5028_v11, %v2742_v38 }
 0x3f9   : > { %v2772_v8 = vadd.f32 %v5030_v50, %v2740_v59  ;;  %2787 = vxpose.xlu0.b32.cont [13/16] (narrow) %v2771_v10, 64 }
 0x3fd   : > { %2788 = vxpose.xlu0.b32.cont [14/16] (narrow) %v2772_v8, 64 }
 0x401   : > { %2789 = vxpose.xlu0.b32.cont [15/16] (narrow) %v2773_v39, 64 }
 0x405   : > { %2790 = vxpose.xlu0.b32.end [16/16] (narrow) %v2774_v6, 64 }
 0x42e   : > { %3752 = vset.pattern.permute.xlu0 %v5153_v18 }
 0x449   : > { %v2791_v43 = vpop.trf.xlu0 }
 0x44a   : > { %2807 = vst [vmem:[%s241_s24] sm:$0xff] %v2791_v43 }
 0x44d   : > { %v2792_v57 = vpop.trf.xlu0 }
 0x44e   : > { %2808 = vst [vmem:[%s241_s24 + $0x8] sm:$0xff] %v2792_v57 }
 0x451   : > { %v2793_v54 = vpop.trf.xlu0 }
 0x452   : > { %2809 = vst [vmem:[%s241_s24 + $0x10] sm:$0xff] %v2793_v54 }
 0x455   : > { %v2794_v55 = vpop.trf.xlu0 }
 0x456   : > { %2810 = vst [vmem:[%s241_s24 + $0x18] sm:$0xff] %v2794_v55 }
 0x459   : > { %v2795_v11 = vpop.trf.xlu0 }
 0x45a   : > { %2811 = vst [vmem:[%s241_s24 + $0x20] sm:$0xff] %v2795_v11 }
 0x45d   : > { %v2796_v50 = vpop.trf.xlu0 }
 0x45e   : > { %2812 = vst [vmem:[%s241_s24 + $0x28] sm:$0xff] %v2796_v50 }
 0x461   : > { %v2797_v3 = vpop.trf.xlu0 }
 0x462   : > { %2813 = vst [vmem:[%s241_s24 + $0x30] sm:$0xff] %v2797_v3 }
 0x465   : > { %v2798_v18 = vpop.trf.xlu0 }
 0x466   : > { %2814 = vst [vmem:[%s241_s24 + $0x38] sm:$0xff] %v2798_v18 }
 0x467   : > { %3844 = shalt.err (!%p3841_p5)
}
 0x468   : > { %s3845_s14 = scalar_lea.hbm %s5072_s8, 1024  ;;  %s3849_s11 = scalar_lea.hbm %s5125_s5, 2048 }
 0x469   : > { %p3846_p6 = scmp.ne.s32.totalorder %s5072_s8, %s3845_s14  ;;  %p3850_p10 = scmp.lt.u32.totalorder %s5072_s8, %s5125_s5 }
 0x46a   : > { %p3851_p11 = scmp.lt.u32.totalorder %s3849_s11, %s3845_s14  ;;  %p3853_p13 = scmp.lt.u32.totalorder %s3845_s14, %s5072_s8 }
 0x46b   : > { %p3847_p7 = pnand %p3846_p6, %p3991_p4 }
 0x46c   : > { %p3852_p12 = por %p3851_p11, %p3850_p10 }
 0x46d   : > { %p3848_p9 = pneg %p3847_p7 }
 0x46e   : > { %p3854_p0 = por %p3853_p13, %p3852_p12 }
 0x470   : > { %p3855_p1 = pnand %p3854_p0, %p3848_p9 }
 0x472   : > { %3858 = shalt.err (!%p3855_p1)
}
 0x473   : > { %s3919_s27 = smov 128   ;;  %s3920_s29 = smov 8  }
 0x474   : > { %3162 = dma.vmem_to_hbm [thread:$0]  (%p3991_p4), %s5067_s25, 1024, %s5072_s8, %s5074_s9, %s3919_s27, %s3919_s27, %s3920_s29  }
 0x475 PF: > { %p3168_p2 = scmp.ge.s32.totalorder %s3909_s23, 2  ;;  %s2845_s7 = sand.u32 1, %s3889_s18  }
 0x476   : > { %s2846_s10 = scalar_lea.sflag [#allocation3], %s2845_s7 }
 0x477   : > { %p3165_p3 = pnand %p3168_p2, %p3998_p8 }
 0x479   : > { %3884 = dma.done.wait (!%p3165_p3), %s2846_s10, 1024  }
 0x47a   : > { %3886 = vsyncadd (!%p3165_p3), %s2846_s10, 4294966272  ;;  %s18_s23 = sadd.s32 1, %s3909_s23   ;;  %s5164_s18 = smov %s3893_s19 }
 0x47b   : > { %p15_p5 = scmp.ge.s32.totalorder %s18_s23, 4   ;;  %s5165_s19 = smov %s3897_s20 }
 0x47c   : > { %s5166_s20 = smov %s4004_s6  ;;  %s5167_s21 = smov %s3905_s22 }
 0x47d   : > { %s5168_s22 = smov %s5170_s26  ;;  %17 = sbr.rel (!%p15_p5) target bundleno = 4 (0x4), region = 75 }
 0x484   :  { %2851 = vsyncpa [#allocation3], 1 }
 0x485   :  { %2853 = vsyncpa [#allocation3 + $0x1], 1 }

</bundles_post_ra>
